<compile_context>
chip_gen: v7x
topology: tpu7x:2x2x1
jax: 0.10.0
libtpu: 0.0.40
codegen_flags: <defaults>
</compile_context>

<pallas_src>
import functools

import jax
import jax.numpy as jnp
from jax import lax
from jax.experimental import pallas as pl
from jax.experimental.pallas import tpu as pltpu


def _mimn_kernel(patch_ref, c_ref, w_ref,
                 gh_ref, bh_ref, gx_ref, bx_ref,
                 ctw_ref, ocw_ref, seg_ref, segt_ref,
                 h_new_ref, c_new_ref,
                 *, nh, eps, forget_bias):
    """One grid step == one block of B batch samples (lane-concatenated).

    patch_ref : (2*K*K*Cin, B*HW) bf16  [h-patches rows; x-patches below]
    c_ref     : (nh, B*HW)        f32
    w_ref     : (8*nh, 2*K*K*Cin) bf16  block-diagonal [wh | 0 ; 0 | wx]
    g*/b*     : (4*nh, B*HW)      f32   LayerNorm affine, lane-tiled per sample
    ctw_ref   : (2*nh, B*HW)      f32
    ocw_ref   : (nh, B*HW)        f32
    seg_ref   : (B*HW, B)         f32   one-hot lane->sample (stats on MXU)
    segt_ref  : (B, B*HW)         f32   transpose (per-sample broadcast back)
    outputs   : (nh, B*HW)        f32   lane-dense stores
    """
    C4 = 4 * nh
    B = segt_ref.shape[0]
    HW = segt_ref.shape[1] // B
    inv_n = 1.0 / float(C4 * HW)

    # --- both convs fused into a single block-diagonal MXU matmul -----------
    y_all = jnp.dot(w_ref[...], patch_ref[...],
                    preferred_element_type=jnp.float32)       # (8*nh, B*HW)

    # --- per-sample LayerNorm statistics -------------------------------------
    # Lane-direction segmented sums go through the MXU (idle between convs);
    # only the small sublane reduce uses the XLU.
    seg = seg_ref[...]
    s1 = jnp.dot(y_all, seg, preferred_element_type=jnp.float32)           # (8nh, B)
    s2 = jnp.dot(y_all * y_all, seg, preferred_element_type=jnp.float32)   # (8nh, B)
    s1_h = jnp.sum(s1[:C4], axis=0, keepdims=True)             # (1, B)
    s1_x = jnp.sum(s1[C4:], axis=0, keepdims=True)
    s2_h = jnp.sum(s2[:C4], axis=0, keepdims=True)
    s2_x = jnp.sum(s2[C4:], axis=0, keepdims=True)
    m_h = s1_h * inv_n
    m_x = s1_x * inv_n
    # clamp: single-pass E[x^2]-E[x]^2 can go slightly negative -> NaN in rsqrt
    v_h = jnp.maximum(s2_h * inv_n - m_h * m_h, 0.0)
    v_x = jnp.maximum(s2_x * inv_n - m_x * m_x, 0.0)
    r_h = lax.rsqrt(v_h + eps)
    r_x = lax.rsqrt(v_x + eps)

    # broadcast per-sample scale/shift back to per-lane vectors (tiny matmuls)
    segt = segt_ref[...]
    scale_h = jnp.dot(r_h, segt, preferred_element_type=jnp.float32)        # (1, B*HW)
    shift_h = jnp.dot(-(m_h * r_h), segt, preferred_element_type=jnp.float32)
    scale_x = jnp.dot(r_x, segt, preferred_element_type=jnp.float32)
    shift_x = jnp.dot(-(m_x * r_x), segt, preferred_element_type=jnp.float32)

    h_concat = (y_all[:C4] * scale_h + shift_h) * gh_ref[...] + bh_ref[...]
    x_concat = (y_all[C4:] * scale_x + shift_x) * gx_ref[...] + bx_ref[...]

    # --- gate math (f32 on the VPU; all slices are sublane-row slices) ------
    c_t = c_ref[...]                                 # (nh, B*HW)
    ctw = ctw_ref[...]
    i_c = c_t * ctw[:nh]
    f_c = c_t * ctw[nh:]

    i_h = h_concat[0 * nh:1 * nh]
    g_h = h_concat[1 * nh:2 * nh]
    f_h = h_concat[2 * nh:3 * nh]
    o_h = h_concat[3 * nh:4 * nh]
    i_x = x_concat[0 * nh:1 * nh]
    g_x = x_concat[1 * nh:2 * nh]
    f_x = x_concat[2 * nh:3 * nh]
    o_x = x_concat[3 * nh:4 * nh]

    i_ = jax.nn.sigmoid(i_h + i_c + i_x)
    f_ = jax.nn.sigmoid(f_h + f_c + f_x + forget_bias)
    g_ = jnp.tanh(g_h + g_x)
    o_ = o_h + o_x

    c_new = f_ * c_t + i_ * g_
    h_new = jax.nn.sigmoid(o_ + c_new * ocw_ref[...]) * jnp.tanh(c_new)

    h_new_ref[...] = h_new.astype(h_new_ref.dtype)
    c_new_ref[...] = c_new.astype(c_new_ref.dtype)


def _pick_batch_block(n, hw):
    """Largest divisor of n (<=16) keeping blocks 128-lane-aligned.

    Batching several samples per grid step amortizes the ~0.35us per-step
    overhead and widens the matmul lane dimension to >=512 so all MXU arrays
    (v5e 4x128, v6e/v7x 2x256) are fed.  (On v7x also try to keep n//B even
    so both TensorCores get work; with tiny n that is not always possible.)
    """
    best = 1
    for b in range(1, min(n, 16) + 1):
        if n % b == 0 and ((b * hw) % 128 == 0 or b == n):
            best = b
    return best


def mimn_forward(x, h_t, c_t, params, *, filter_size, num_hidden):
    """x, h_t: (N, Cin, H, W) f32; c_t: (N, num_hidden, H, W) f32 (NCHW)."""
    N, C, H, W = x.shape
    K = filter_size
    p = K // 2
    nh = num_hidden
    HW = H * W
    KKC = K * K * C
    C4 = 4 * nh

    assert h_t.shape == x.shape, "h_t must match x (conv input channels)"
    assert c_t.shape == (N, nh, H, W), \
        "c_t must have num_hidden channels (required by ct_weight broadcast)"

    B = _pick_batch_block(N, HW)
    blk = B * HW                      # lanes per grid step
    grid = (N // B,)

    # --- glue: zero "same" padding + im2col (tap-major rows, samples on lanes)
    def im2col(a):                    # (N, C, H, W) -> (K*K*C, N*HW) bf16
        ap = jnp.pad(a, ((0, 0), (0, 0), (p, p), (p, p)))
        cols = jnp.stack([ap[:, :, dh:dh + H, dw:dw + W]
                          for dh in range(K) for dw in range(K)], axis=0)
        # (KK, N, C, H, W) -> (KK, C, N, H, W) -> (KKC, N*HW)
        return cols.transpose(0, 2, 1, 3, 4).reshape(KKC, N * HW).astype(jnp.bfloat16)

    patch = jnp.concatenate([im2col(h_t), im2col(x)], axis=0)   # (2*KKC, N*HW)

    # conv weights -> tap-major (dh, dw, cin) columns, packed block-diagonally
    # so both convs are one MXU call (one weight stage / one result drain).
    def conv_w(w):
        return jnp.transpose(w, (0, 2, 3, 1)).reshape(C4, KKC).astype(jnp.bfloat16)
    w_fused = jnp.zeros((2 * C4, 2 * KKC), jnp.bfloat16)
    w_fused = w_fused.at[:C4, :KKC].set(conv_w(params['wh']))
    w_fused = w_fused.at[C4:, KKC:].set(conv_w(params['wx']))

    # LayerNorm affine / cell weights: (c, H, W) -> (c, B*HW), lane-tiled per
    # sample in the block (resident constants, DMA'd once).
    def tile_hw(a):
        return jnp.tile(a.reshape(a.shape[0], HW), (1, B))
    gh, bh = tile_hw(params['ln_h_g']), tile_hw(params['ln_h_b'])
    gx, bx = tile_hw(params['ln_x_g']), tile_hw(params['ln_x_b'])
    ctw = tile_hw(params['ct_weight'])               # (2*nh, B*HW)
    ocw = tile_hw(params['oc_weight'])               # (nh,   B*HW)

    # lane -> sample one-hot matrices for segmented LayerNorm statistics
    lane_sample = jnp.arange(blk, dtype=jnp.int32) // HW
    seg_t = (lane_sample[None, :] ==
             jnp.arange(B, dtype=jnp.int32)[:, None]).astype(jnp.float32)   # (B, B*HW)
    seg = seg_t.T                                                           # (B*HW, B)

    # c_t / outputs: channels-first with samples concatenated on lanes
    c_cf = jnp.transpose(c_t, (1, 0, 2, 3)).reshape(nh, N * HW)

    kern = functools.partial(_mimn_kernel, nh=nh, eps=1e-5, forget_bias=1.0)

    def const_spec(shape):
        nd = len(shape)
        return pl.BlockSpec(shape, lambda n, _nd=nd: (0,) * _nd)

    def lane_spec(rows):
        return pl.BlockSpec((rows, blk), lambda n: (0, n))

    grid_spec = pltpu.PrefetchScalarGridSpec(
        num_scalar_prefetch=0,
        grid=grid,
        in_specs=[
            lane_spec(2 * KKC),              # fused im2col patches
            lane_spec(nh),                   # c_t
            const_spec((2 * C4, 2 * KKC)),   # fused conv weight
            const_spec((C4, blk)),           # ln_h gamma
            const_spec((C4, blk)),           # ln_h beta
            const_spec((C4, blk)),           # ln_x gamma
            const_spec((C4, blk)),           # ln_x beta
            const_spec((2 * nh, blk)),       # ct_weight
            const_spec((nh, blk)),           # oc_weight
            const_spec((blk, B)),            # seg
            const_spec((B, blk)),            # seg^T
        ],
        out_specs=[
            lane_spec(nh),                   # h_new
            lane_spec(nh),                   # c_new
        ],
    )

    # --- explicit VMEM budget (v7x has only 64 MiB physical) ----------------
    f32b, bf16b = 4, 2
    pipe = 2 * (2 * KKC * blk * bf16b + nh * blk * f32b + 2 * nh * blk * f32b)
    consts = 2 * (2 * C4 * 2 * KKC * bf16b + 4 * C4 * blk * f32b
                  + 3 * nh * blk * f32b
                  + blk * 128 * f32b + 8 * blk * f32b)   # seg lane-pads to 128
    slack = 8 * 2 * C4 * blk * f32b                      # y_all / squares / gates
    vmem_limit = int(min(96 * 2 ** 20, max(32 * 2 ** 20, 2 * (pipe + consts + slack))))

    cost = pl.CostEstimate(
        flops=2 * (2 * C4) * (2 * KKC) * (N * HW) + 30 * nh * N * HW,
        transcendentals=5 * nh * N * HW,
        bytes_accessed=(2 * KKC * N * HW * bf16b + 3 * nh * N * HW * f32b
                        + 4 * C4 * blk * f32b + 3 * nh * blk * f32b),
    )

    h_cf, c_cf_new = pl.pallas_call(
        kern,
        out_shape=(jax.ShapeDtypeStruct((nh, N * HW), jnp.float32),
                   jax.ShapeDtypeStruct((nh, N * HW), jnp.float32)),
        grid_spec=grid_spec,
        compiler_params=pltpu.CompilerParams(
            dimension_semantics=("parallel",),
            vmem_limit_bytes=vmem_limit),
        cost_estimate=cost,
    )(patch, c_cf, w_fused, gh, bh, gx, bx, ctw, ocw, seg, seg_t)

    def unflat(a):                    # (nh, N*HW) -> (N, nh, H, W)
        return a.reshape(nh, N, H, W).transpose(1, 0, 2, 3)
    return unflat(h_cf), unflat(c_cf_new)


def mimn_reference(x, h_t, c_t, params, *, filter_size, num_hidden):
    """Pure-JAX NCHW reference (mirrors the PyTorch forward exactly)."""
    p = filter_size // 2

    def conv(inp, w):
        return lax.conv_general_dilated(
            inp, w, window_strides=(1, 1), padding=[(p, p), (p, p)],
            dimension_numbers=('NCHW', 'OIHW', 'NCHW'))

    def layernorm(y, g, b):
        mean = jnp.mean(y, axis=(1, 2, 3), keepdims=True)
        var = jnp.mean(jnp.square(y - mean), axis=(1, 2, 3), keepdims=True)
        return (y - mean) * lax.rsqrt(var + 1e-5) * g[None] + b[None]

    h_concat = layernorm(conv(h_t, params['wh']),
                         params['ln_h_g'], params['ln_h_b'])
    x_concat = layernorm(conv(x, params['wx']),
                         params['ln_x_g'], params['ln_x_b'])
    i_h, g_h, f_h, o_h = jnp.split(h_concat, 4, axis=1)
    ct_act = jnp.tile(c_t, (1, 2, 1, 1)) * params['ct_weight'][None]
    i_c, f_c = jnp.split(ct_act, 2, axis=1)
    i_x, g_x, f_x, o_x = jnp.split(x_concat, 4, axis=1)
    i_ = jax.nn.sigmoid(i_h + i_c + i_x)
    f_ = jax.nn.sigmoid(f_h + f_c + f_x + 1.0)
    g_ = jnp.tanh(g_h + g_x)
    o_ = o_h + o_x
    c_new = f_ * c_t + i_ * g_
    o_c = c_new * params['oc_weight'][None]
    h_new = jax.nn.sigmoid(o_ + o_c) * jnp.tanh(c_new)
    return h_new, c_new


if __name__ == "__main__":
    # Small shapes consistent with the module.  in_channel == num_hidden
    # (required by the ct_weight broadcast in the original forward).
    N, nh, H, W, K = 2, 8, 16, 16, 3
    C = nh

    key = jax.random.PRNGKey(0)
    ks = jax.random.split(key, 11)
    # Deterministic synthetic parameters (module __init__ gives the shapes).
    # ct_weight/oc_weight are zeros in PyTorch init; random values here so
    # those code paths are actually exercised.
    params = {
        'wx': 0.1 * jax.random.normal(ks[0], (4 * nh, C, K, K), jnp.float32),
        'wh': 0.1 * jax.random.normal(ks[1], (4 * nh, C, K, K), jnp.float32),
        'ln_x_g': 1.0 + 0.1 * jax.random.normal(ks[2], (4 * nh, H, W), jnp.float32),
        'ln_x_b': 0.1 * jax.random.normal(ks[3], (4 * nh, H, W), jnp.float32),
        'ln_h_g': 1.0 + 0.1 * jax.random.normal(ks[4], (4 * nh, H, W), jnp.float32),
        'ln_h_b': 0.1 * jax.random.normal(ks[5], (4 * nh, H, W), jnp.float32),
        'ct_weight': 0.5 * jax.random.normal(ks[6], (2 * nh, H, W), jnp.float32),
        'oc_weight': 0.5 * jax.random.normal(ks[7], (nh, H, W), jnp.float32),
    }
    x = jax.random.normal(ks[8], (N, C, H, W), jnp.float32)
    h_t = jax.random.normal(ks[9], (N, C, H, W), jnp.float32)
    c_t = jax.random.normal(ks[10], (N, nh, H, W), jnp.float32)

    h_new, c_new = mimn_forward(x, h_t, c_t, params,
                                filter_size=K, num_hidden=nh)
    jax.block_until_ready((h_new, c_new))

    h_ref, c_ref = mimn_reference(x, h_t, c_t, params,
                                  filter_size=K, num_hidden=nh)
    # bf16 conv operands (f32 accumulate) -> slightly looser tolerance.
    assert jnp.allclose(h_new, h_ref, atol=2e-2, rtol=2e-2), "h_new mismatch"
    assert jnp.allclose(c_new, c_ref, atol=2e-2, rtol=2e-2), "c_new mismatch"

    print("KERNEL_OK")
</pallas_src>

<mosaic_0001>
module attributes {stable_mosaic.version = 11 : i64} {
  func.func @_mimn_kernel(%arg0: i32, %arg1: memref<144x512xbf16, #tpu.memory_space<vmem>>, %arg2: memref<8x512xf32, #tpu.memory_space<vmem>>, %arg3: memref<64x144xbf16, #tpu.memory_space<vmem>>, %arg4: memref<32x512xf32, #tpu.memory_space<vmem>>, %arg5: memref<32x512xf32, #tpu.memory_space<vmem>>, %arg6: memref<32x512xf32, #tpu.memory_space<vmem>>, %arg7: memref<32x512xf32, #tpu.memory_space<vmem>>, %arg8: memref<16x512xf32, #tpu.memory_space<vmem>>, %arg9: memref<8x512xf32, #tpu.memory_space<vmem>>, %arg10: memref<512x2xf32, #tpu.memory_space<vmem>>, %arg11: memref<2x512xf32, #tpu.memory_space<vmem>>, %arg12: memref<8x512xf32, #tpu.memory_space<vmem>>, %arg13: memref<8x512xf32, #tpu.memory_space<vmem>>) attributes {dimension_semantics = [#tpu.dimension_semantics<parallel>], iteration_bounds = array<i64: 1>, scalar_prefetch = 0 : i64, scratch_operands = 0 : i64, tpu.core_type = #tpu.core_type<tc>, window_params = [{transform_indices = @transform_0, window_bounds = array<i64: 144, 512>}, {transform_indices = @transform_1, window_bounds = array<i64: 8, 512>}, {pipeline_mode = #tpu.pipeline_mode<synchronous>, transform_indices = @transform_2, window_bounds = array<i64: 64, 144>}, {pipeline_mode = #tpu.pipeline_mode<synchronous>, transform_indices = @transform_3, window_bounds = array<i64: 32, 512>}, {pipeline_mode = #tpu.pipeline_mode<synchronous>, transform_indices = @transform_4, window_bounds = array<i64: 32, 512>}, {pipeline_mode = #tpu.pipeline_mode<synchronous>, transform_indices = @transform_5, window_bounds = array<i64: 32, 512>}, {pipeline_mode = #tpu.pipeline_mode<synchronous>, transform_indices = @transform_6, window_bounds = array<i64: 32, 512>}, {pipeline_mode = #tpu.pipeline_mode<synchronous>, transform_indices = @transform_7, window_bounds = array<i64: 16, 512>}, {pipeline_mode = #tpu.pipeline_mode<synchronous>, transform_indices = @transform_8, window_bounds = array<i64: 8, 512>}, {pipeline_mode = #tpu.pipeline_mode<synchronous>, transform_indices = @transform_9, window_bounds = array<i64: 512, 2>}, {pipeline_mode = #tpu.pipeline_mode<synchronous>, transform_indices = @transform_10, window_bounds = array<i64: 2, 512>}, {transform_indices = @transform_11, window_bounds = array<i64: 8, 512>}, {transform_indices = @transform_12, window_bounds = array<i64: 8, 512>}]} {
    %c0 = arith.constant 0 : index
    %c0_0 = arith.constant 0 : index
    %0 = vector.load %arg3[%c0, %c0_0] : memref<64x144xbf16, #tpu.memory_space<vmem>>, vector<64x144xbf16>
    %c0_1 = arith.constant 0 : index
    %c0_2 = arith.constant 0 : index
    %1 = vector.load %arg1[%c0_1, %c0_2] : memref<144x512xbf16, #tpu.memory_space<vmem>>, vector<144x512xbf16>
    %cst = arith.constant dense<0.000000e+00> : vector<64x512xf32>
    %2 = tpu.matmul %0, %1, %cst {dimension_numbers = #tpu.dot_dimension_numbers<[1], [0], [0], [1], [0, 0, 1, 1], [], []>} : vector<64x144xbf16>, vector<144x512xbf16>, vector<64x512xf32> -> vector<64x512xf32>
    %c0_3 = arith.constant 0 : index
    %c0_4 = arith.constant 0 : index
    %3 = vector.load %arg10[%c0_3, %c0_4] : memref<512x2xf32, #tpu.memory_space<vmem>>, vector<512x2xf32>
    %cst_5 = arith.constant dense<0.000000e+00> : vector<64x2xf32>
    %4 = tpu.matmul %2, %3, %cst_5 {dimension_numbers = #tpu.dot_dimension_numbers<[1], [0], [0], [1], [0, 0, 1, 1], [], []>} : vector<64x512xf32>, vector<512x2xf32>, vector<64x2xf32> -> vector<64x2xf32>
    %5 = arith.mulf %2, %2 : vector<64x512xf32>
    %cst_6 = arith.constant dense<0.000000e+00> : vector<64x2xf32>
    %6 = tpu.matmul %5, %3, %cst_6 {dimension_numbers = #tpu.dot_dimension_numbers<[1], [0], [0], [1], [0, 0, 1, 1], [], []>} : vector<64x512xf32>, vector<512x2xf32>, vector<64x2xf32> -> vector<64x2xf32>
    %7 = vector.extract_strided_slice %4 {offsets = [0, 0], sizes = [32, 2], strides = [1, 1]} : vector<64x2xf32> to vector<32x2xf32>
    %cst_7 = arith.constant dense<0.000000e+00> : vector<2xf32>
    %8 = vector.multi_reduction <add>, %7, %cst_7 [0] : vector<32x2xf32> to vector<2xf32>
    %9 = vector.shape_cast %8 : vector<2xf32> to vector<1x2xf32>
    %10 = vector.extract_strided_slice %4 {offsets = [32, 0], sizes = [32, 2], strides = [1, 1]} : vector<64x2xf32> to vector<32x2xf32>
    %cst_8 = arith.constant dense<0.000000e+00> : vector<2xf32>
    %11 = vector.multi_reduction <add>, %10, %cst_8 [0] : vector<32x2xf32> to vector<2xf32>
    %12 = vector.shape_cast %11 : vector<2xf32> to vector<1x2xf32>
    %13 = vector.extract_strided_slice %6 {offsets = [0, 0], sizes = [32, 2], strides = [1, 1]} : vector<64x2xf32> to vector<32x2xf32>
    %cst_9 = arith.constant dense<0.000000e+00> : vector<2xf32>
    %14 = vector.multi_reduction <add>, %13, %cst_9 [0] : vector<32x2xf32> to vector<2xf32>
    %15 = vector.shape_cast %14 : vector<2xf32> to vector<1x2xf32>
    %16 = vector.extract_strided_slice %6 {offsets = [32, 0], sizes = [32, 2], strides = [1, 1]} : vector<64x2xf32> to vector<32x2xf32>
    %cst_10 = arith.constant dense<0.000000e+00> : vector<2xf32>
    %17 = vector.multi_reduction <add>, %16, %cst_10 [0] : vector<32x2xf32> to vector<2xf32>
    %18 = vector.shape_cast %17 : vector<2xf32> to vector<1x2xf32>
    %cst_11 = arith.constant 1.22070313E-4 : f32
    %19 = vector.broadcast %cst_11 : f32 to vector<1x2xf32>
    %20 = arith.mulf %9, %19 : vector<1x2xf32>
    %cst_12 = arith.constant 1.22070313E-4 : f32
    %21 = vector.broadcast %cst_12 : f32 to vector<1x2xf32>
    %22 = arith.mulf %12, %21 : vector<1x2xf32>
    %cst_13 = arith.constant 1.22070313E-4 : f32
    %23 = vector.broadcast %cst_13 : f32 to vector<1x2xf32>
    %24 = arith.mulf %15, %23 : vector<1x2xf32>
    %25 = arith.mulf %20, %20 : vector<1x2xf32>
    %26 = arith.subf %24, %25 : vector<1x2xf32>
    %cst_14 = arith.constant 0.000000e+00 : f32
    %27 = vector.broadcast %cst_14 : f32 to vector<1x2xf32>
    %28 = arith.maximumf %26, %27 : vector<1x2xf32>
    %cst_15 = arith.constant 1.22070313E-4 : f32
    %29 = vector.broadcast %cst_15 : f32 to vector<1x2xf32>
    %30 = arith.mulf %18, %29 : vector<1x2xf32>
    %31 = arith.mulf %22, %22 : vector<1x2xf32>
    %32 = arith.subf %30, %31 : vector<1x2xf32>
    %cst_16 = arith.constant 0.000000e+00 : f32
    %33 = vector.broadcast %cst_16 : f32 to vector<1x2xf32>
    %34 = arith.maximumf %32, %33 : vector<1x2xf32>
    %cst_17 = arith.constant 9.99999974E-6 : f32
    %35 = vector.broadcast %cst_17 : f32 to vector<1x2xf32>
    %36 = arith.addf %28, %35 : vector<1x2xf32>
    %37 = math.rsqrt %36 : vector<1x2xf32>
    %cst_18 = arith.constant 9.99999974E-6 : f32
    %38 = vector.broadcast %cst_18 : f32 to vector<1x2xf32>
    %39 = arith.addf %34, %38 : vector<1x2xf32>
    %40 = math.rsqrt %39 : vector<1x2xf32>
    %c0_19 = arith.constant 0 : index
    %c0_20 = arith.constant 0 : index
    %41 = vector.load %arg11[%c0_19, %c0_20] : memref<2x512xf32, #tpu.memory_space<vmem>>, vector<2x512xf32>
    %cst_21 = arith.constant dense<0.000000e+00> : vector<1x512xf32>
    %42 = tpu.matmul %37, %41, %cst_21 {dimension_numbers = #tpu.dot_dimension_numbers<[1], [0], [0], [1], [0, 0, 1, 1], [], []>} : vector<1x2xf32>, vector<2x512xf32>, vector<1x512xf32> -> vector<1x512xf32>
    %43 = arith.mulf %20, %37 : vector<1x2xf32>
    %cst_22 = arith.constant 0.000000e+00 : f32
    %44 = vector.broadcast %cst_22 : f32 to vector<1x2xf32>
    %45 = arith.subf %44, %43 : vector<1x2xf32>
    %cst_23 = arith.constant dense<0.000000e+00> : vector<1x512xf32>
    %46 = tpu.matmul %45, %41, %cst_23 {dimension_numbers = #tpu.dot_dimension_numbers<[1], [0], [0], [1], [0, 0, 1, 1], [], []>} : vector<1x2xf32>, vector<2x512xf32>, vector<1x512xf32> -> vector<1x512xf32>
    %cst_24 = arith.constant dense<0.000000e+00> : vector<1x512xf32>
    %47 = tpu.matmul %40, %41, %cst_24 {dimension_numbers = #tpu.dot_dimension_numbers<[1], [0], [0], [1], [0, 0, 1, 1], [], []>} : vector<1x2xf32>, vector<2x512xf32>, vector<1x512xf32> -> vector<1x512xf32>
    %48 = arith.mulf %22, %40 : vector<1x2xf32>
    %cst_25 = arith.constant 0.000000e+00 : f32
    %49 = vector.broadcast %cst_25 : f32 to vector<1x2xf32>
    %50 = arith.subf %49, %48 : vector<1x2xf32>
    %cst_26 = arith.constant dense<0.000000e+00> : vector<1x512xf32>
    %51 = tpu.matmul %50, %41, %cst_26 {dimension_numbers = #tpu.dot_dimension_numbers<[1], [0], [0], [1], [0, 0, 1, 1], [], []>} : vector<1x2xf32>, vector<2x512xf32>, vector<1x512xf32> -> vector<1x512xf32>
    %52 = vector.extract_strided_slice %2 {offsets = [0, 0], sizes = [32, 512], strides = [1, 1]} : vector<64x512xf32> to vector<32x512xf32>
    %53 = vector.broadcast %42 : vector<1x512xf32> to vector<32x512xf32>
    %54 = arith.mulf %52, %53 : vector<32x512xf32>
    %55 = vector.broadcast %46 : vector<1x512xf32> to vector<32x512xf32>
    %56 = arith.addf %54, %55 : vector<32x512xf32>
    %c0_27 = arith.constant 0 : index
    %c0_28 = arith.constant 0 : index
    %57 = vector.load %arg4[%c0_27, %c0_28] : memref<32x512xf32, #tpu.memory_space<vmem>>, vector<32x512xf32>
    %58 = arith.mulf %56, %57 : vector<32x512xf32>
    %c0_29 = arith.constant 0 : index
    %c0_30 = arith.constant 0 : index
    %59 = vector.load %arg5[%c0_29, %c0_30] : memref<32x512xf32, #tpu.memory_space<vmem>>, vector<32x512xf32>
    %60 = arith.addf %58, %59 : vector<32x512xf32>
    %61 = vector.extract_strided_slice %2 {offsets = [32, 0], sizes = [32, 512], strides = [1, 1]} : vector<64x512xf32> to vector<32x512xf32>
    %62 = vector.broadcast %47 : vector<1x512xf32> to vector<32x512xf32>
    %63 = arith.mulf %61, %62 : vector<32x512xf32>
    %64 = vector.broadcast %51 : vector<1x512xf32> to vector<32x512xf32>
    %65 = arith.addf %63, %64 : vector<32x512xf32>
    %c0_31 = arith.constant 0 : index
    %c0_32 = arith.constant 0 : index
    %66 = vector.load %arg6[%c0_31, %c0_32] : memref<32x512xf32, #tpu.memory_space<vmem>>, vector<32x512xf32>
    %67 = arith.mulf %65, %66 : vector<32x512xf32>
    %c0_33 = arith.constant 0 : index
    %c0_34 = arith.constant 0 : index
    %68 = vector.load %arg7[%c0_33, %c0_34] : memref<32x512xf32, #tpu.memory_space<vmem>>, vector<32x512xf32>
    %69 = arith.addf %67, %68 : vector<32x512xf32>
    %c0_35 = arith.constant 0 : index
    %c0_36 = arith.constant 0 : index
    %70 = vector.load %arg2[%c0_35, %c0_36] : memref<8x512xf32, #tpu.memory_space<vmem>>, vector<8x512xf32>
    %c0_37 = arith.constant 0 : index
    %c0_38 = arith.constant 0 : index
    %71 = vector.load %arg8[%c0_37, %c0_38] : memref<16x512xf32, #tpu.memory_space<vmem>>, vector<16x512xf32>
    %72 = vector.extract_strided_slice %71 {offsets = [0, 0], sizes = [8, 512], strides = [1, 1]} : vector<16x512xf32> to vector<8x512xf32>
    %73 = arith.mulf %70, %72 : vector<8x512xf32>
    %74 = vector.extract_strided_slice %71 {offsets = [8, 0], sizes = [8, 512], strides = [1, 1]} : vector<16x512xf32> to vector<8x512xf32>
    %75 = arith.mulf %70, %74 : vector<8x512xf32>
    %76 = vector.extract_strided_slice %60 {offsets = [0, 0], sizes = [8, 512], strides = [1, 1]} : vector<32x512xf32> to vector<8x512xf32>
    %77 = vector.extract_strided_slice %60 {offsets = [8, 0], sizes = [8, 512], strides = [1, 1]} : vector<32x512xf32> to vector<8x512xf32>
    %78 = vector.extract_strided_slice %60 {offsets = [16, 0], sizes = [8, 512], strides = [1, 1]} : vector<32x512xf32> to vector<8x512xf32>
    %79 = vector.extract_strided_slice %60 {offsets = [24, 0], sizes = [8, 512], strides = [1, 1]} : vector<32x512xf32> to vector<8x512xf32>
    %80 = vector.extract_strided_slice %69 {offsets = [0, 0], sizes = [8, 512], strides = [1, 1]} : vector<32x512xf32> to vector<8x512xf32>
    %81 = vector.extract_strided_slice %69 {offsets = [8, 0], sizes = [8, 512], strides = [1, 1]} : vector<32x512xf32> to vector<8x512xf32>
    %82 = vector.extract_strided_slice %69 {offsets = [16, 0], sizes = [8, 512], strides = [1, 1]} : vector<32x512xf32> to vector<8x512xf32>
    %83 = vector.extract_strided_slice %69 {offsets = [24, 0], sizes = [8, 512], strides = [1, 1]} : vector<32x512xf32> to vector<8x512xf32>
    %84 = arith.addf %76, %73 : vector<8x512xf32>
    %85 = arith.addf %84, %80 : vector<8x512xf32>
    %86 = arith.negf %85 : vector<8x512xf32>
    %87 = math.exp %86 : vector<8x512xf32>
    %cst_39 = arith.constant 1.000000e+00 : f32
    %88 = vector.broadcast %cst_39 : f32 to vector<8x512xf32>
    %89 = arith.addf %88, %87 : vector<8x512xf32>
    %90 = arith.divf %88, %89 : vector<8x512xf32>
    %91 = arith.addf %78, %75 : vector<8x512xf32>
    %92 = arith.addf %91, %82 : vector<8x512xf32>
    %cst_40 = arith.constant 1.000000e+00 : f32
    %93 = vector.broadcast %cst_40 : f32 to vector<8x512xf32>
    %94 = arith.addf %92, %93 : vector<8x512xf32>
    %95 = arith.negf %94 : vector<8x512xf32>
    %96 = math.exp %95 : vector<8x512xf32>
    %cst_41 = arith.constant 1.000000e+00 : f32
    %97 = vector.broadcast %cst_41 : f32 to vector<8x512xf32>
    %98 = arith.addf %97, %96 : vector<8x512xf32>
    %99 = arith.divf %97, %98 : vector<8x512xf32>
    %100 = arith.addf %77, %81 : vector<8x512xf32>
    %101 = math.tanh %100 : vector<8x512xf32>
    %102 = arith.addf %79, %83 : vector<8x512xf32>
    %103 = arith.mulf %99, %70 : vector<8x512xf32>
    %104 = arith.mulf %90, %101 : vector<8x512xf32>
    %105 = arith.addf %103, %104 : vector<8x512xf32>
    %c0_42 = arith.constant 0 : index
    %c0_43 = arith.constant 0 : index
    %106 = vector.load %arg9[%c0_42, %c0_43] : memref<8x512xf32, #tpu.memory_space<vmem>>, vector<8x512xf32>
    %107 = arith.mulf %105, %106 : vector<8x512xf32>
    %108 = arith.addf %102, %107 : vector<8x512xf32>
    %109 = arith.negf %108 : vector<8x512xf32>
    %110 = math.exp %109 : vector<8x512xf32>
    %cst_44 = arith.constant 1.000000e+00 : f32
    %111 = vector.broadcast %cst_44 : f32 to vector<8x512xf32>
    %112 = arith.addf %111, %110 : vector<8x512xf32>
    %113 = arith.divf %111, %112 : vector<8x512xf32>
    %114 = math.tanh %105 : vector<8x512xf32>
    %115 = arith.mulf %113, %114 : vector<8x512xf32>
    %c0_45 = arith.constant 0 : index
    %c0_46 = arith.constant 0 : index
    %116 = vector.load %arg12[%c0_45, %c0_46] : memref<8x512xf32, #tpu.memory_space<vmem>>, vector<8x512xf32>
    tpu.vector_store %arg12[%c0_45, %c0_46], %115 {strides = array<i32>} : memref<8x512xf32, #tpu.memory_space<vmem>>, vector<8x512xf32>,
    %c0_47 = arith.constant 0 : index
    %c0_48 = arith.constant 0 : index
    %117 = vector.load %arg13[%c0_47, %c0_48] : memref<8x512xf32, #tpu.memory_space<vmem>>, vector<8x512xf32>
    tpu.vector_store %arg13[%c0_47, %c0_48], %105 {strides = array<i32>} : memref<8x512xf32, #tpu.memory_space<vmem>>, vector<8x512xf32>,
    return
  }
  func.func @transform_0(%arg0: i32) -> (i32, i32) {
    %c0_i32 = arith.constant 0 : i32
    %c0_i32_0 = arith.constant 0 : i32
    return %c0_i32, %arg0 : i32, i32
  }
  func.func @transform_1(%arg0: i32) -> (i32, i32) {
    %c0_i32 = arith.constant 0 : i32
    %c0_i32_0 = arith.constant 0 : i32
    return %c0_i32, %arg0 : i32, i32
  }
  func.func @transform_2(%arg0: i32) -> (i32, i32) {
    %c0_i32 = arith.constant 0 : i32
    %c0_i32_0 = arith.constant 0 : i32
    %c0_i32_1 = arith.constant 0 : i32
    return %c0_i32, %c0_i32_0 : i32, i32
  }
  func.func @transform_3(%arg0: i32) -> (i32, i32) {
    %c0_i32 = arith.constant 0 : i32
    %c0_i32_0 = arith.constant 0 : i32
    %c0_i32_1 = arith.constant 0 : i32
    return %c0_i32, %c0_i32_0 : i32, i32
  }
  func.func @transform_4(%arg0: i32) -> (i32, i32) {
    %c0_i32 = arith.constant 0 : i32
    %c0_i32_0 = arith.constant 0 : i32
    %c0_i32_1 = arith.constant 0 : i32
    return %c0_i32, %c0_i32_0 : i32, i32
  }
  func.func @transform_5(%arg0: i32) -> (i32, i32) {
    %c0_i32 = arith.constant 0 : i32
    %c0_i32_0 = arith.constant 0 : i32
    %c0_i32_1 = arith.constant 0 : i32
    return %c0_i32, %c0_i32_0 : i32, i32
  }
  func.func @transform_6(%arg0: i32) -> (i32, i32) {
    %c0_i32 = arith.constant 0 : i32
    %c0_i32_0 = arith.constant 0 : i32
    %c0_i32_1 = arith.constant 0 : i32
    return %c0_i32, %c0_i32_0 : i32, i32
  }
  func.func @transform_7(%arg0: i32) -> (i32, i32) {
    %c0_i32 = arith.constant 0 : i32
    %c0_i32_0 = arith.constant 0 : i32
    %c0_i32_1 = arith.constant 0 : i32
    return %c0_i32, %c0_i32_0 : i32, i32
  }
  func.func @transform_8(%arg0: i32) -> (i32, i32) {
    %c0_i32 = arith.constant 0 : i32
    %c0_i32_0 = arith.constant 0 : i32
    %c0_i32_1 = arith.constant 0 : i32
    return %c0_i32, %c0_i32_0 : i32, i32
  }
  func.func @transform_9(%arg0: i32) -> (i32, i32) {
    %c0_i32 = arith.constant 0 : i32
    %c0_i32_0 = arith.constant 0 : i32
    %c0_i32_1 = arith.constant 0 : i32
    return %c0_i32, %c0_i32_0 : i32, i32
  }
  func.func @transform_10(%arg0: i32) -> (i32, i32) {
    %c0_i32 = arith.constant 0 : i32
    %c0_i32_0 = arith.constant 0 : i32
    %c0_i32_1 = arith.constant 0 : i32
    return %c0_i32, %c0_i32_0 : i32, i32
  }
  func.func @transform_11(%arg0: i32) -> (i32, i32) {
    %c0_i32 = arith.constant 0 : i32
    %c0_i32_0 = arith.constant 0 : i32
    return %c0_i32, %arg0 : i32, i32
  }
  func.func @transform_12(%arg0: i32) -> (i32, i32) {
    %c0_i32 = arith.constant 0 : i32
    %c0_i32_0 = arith.constant 0 : i32
    return %c0_i32, %arg0 : i32, i32
  }
}

</mosaic_0001>

<bundles_post_ra>
// kernel: tpu_custom_call.1
= control target key start
LH: loop header
LB: loop body
LE: loop exit
PB: predicated region body
PF: predicated region fallthrough
CT: control target
= control target key end

     0   :  { %18 = vsyncpa [#allocation3], 0  ;;  %s4102_s0 = inlined_call_operand.vmem [shape: bf16[144,512], index: 0, kind: input, shape index: {}]   ;;  %s4103_s1 = inlined_call_operand.vmem [shape: f32[8,512], index: 1, kind: input, shape index: {}]   ;;  %s4104_s2 = inlined_call_operand.vmem [shape: bf16[64,144], index: 2, kind: input, shape index: {}]   ;;  %s4105_s3 = inlined_call_operand.vmem [shape: f32[32,512], index: 3, kind: input, shape index: {}]   ;;  %s4106_s4 = inlined_call_operand.hbm [shape: f32[32,512], index: 4, kind: input, shape index: {}]   ;;  %s4107_s5 = inlined_call_operand.hbm [shape: f32[32,512], index: 5, kind: input, shape index: {}]   ;;  %s4108_s6 = inlined_call_operand.hbm [shape: f32[32,512], index: 6, kind: input, shape index: {}]   ;;  %s4109_s7 = inlined_call_operand.hbm [shape: f32[16,512], index: 7, kind: input, shape index: {}]   ;;  %s4110_s8 = inlined_call_operand.vmem [shape: f32[8,512], index: 8, kind: input, shape index: {}]   ;;  %s4111_s9 = inlined_call_operand.vmem [shape: f32[512,2], index: 9, kind: input, shape index: {}]   ;;  %s4112_s10 = inlined_call_operand.hbm [shape: f32[2,512], index: 10, kind: input, shape index: {}]   ;;  %s4113_s11 = inlined_call_operand.hbm [shape: f32[8,512], index: 11, kind: output, shape index: {0}]   ;;  %s4114_s12 = inlined_call_operand.hbm [shape: f32[8,512], index: 12, kind: output, shape index: {1}]  }
   0x1   :  { %19 = vsyncpa [#allocation6], 0 }
   0x2   :  { %20 = vsyncpa [#allocation9], 0 }
   0x3   :  { %21 = vsyncpa [#allocation4], 0 }
   0x4   :  { %22 = vsyncpa [#allocation13], 0  ;;  %s2924_s21 = smov [#allocation5]   ;;  %s2925_s23 = smov [#allocation8]  }
   0x5   :  { %s48_s22 = sshll.u32 %s2924_s21, 4  ;;  %s72_s24 = sshll.u32 %s2925_s23, 4  ;;  %s49_s22 = int_to_ptr.vmem [resolvable:$true] %s48_s22  ;;  %s3000_s24 = int_to_ptr.vmem [resolvable:$true] %s72_s24 }
   0x6   :  { %s2760_s27 = scalar_lea.hbm %s4107_s5, 2048 }
   0x7   :  { %p2761_p0 = scmp.ne.s32.totalorder %s4107_s5, %s2760_s27  ;;  %p2764_p1 = scmp.lt.u32.totalorder %s2760_s27, %s4107_s5 }
   0x9   :  { %p2766_p2 = pnand %p2764_p1, %p2761_p0 }
   0xb   :  { %2769 = shalt.err (!%p2766_p2)
}
   0xc   :  { %s2770_s14 = scalar_lea.vmem %s49_s22, 2048  ;;  %p2775_p4 = scmp.lt.s32.totalorder %s49_s22, %s49_s22 }
   0xd   :  { %p2771_p3 = scmp.ne.s32.totalorder %s49_s22, %s2770_s14  ;;  %p2776_p5 = scmp.lt.s32.totalorder %s2770_s14, %s2770_s14 }
   0xf   :  { %p2777_p6 = por %p2776_p5, %p2775_p4 }
  0x11   :  { %p2778_p7 = pnand %p2777_p6, %p2771_p3 }
  0x13   :  { %2781 = shalt.err (!%p2778_p7)
}
  0x14   :  { %s2926_s15 = smov 512   ;;  %s2927_s16 = smov 32  }
  0x15   :  { %54 = dma.hbm_to_vmem [thread:$0]  %s4107_s5, 2048, %s49_s22, [#allocation6], %s2926_s15, %s2926_s15, %s2927_s16  }
  0x16   :  { %s2782_s21 = scalar_lea.hbm %s4109_s7, 1024 }
  0x17   :  { %p2783_p8 = scmp.ne.s32.totalorder %s4109_s7, %s2782_s21  ;;  %p2786_p9 = scmp.lt.u32.totalorder %s2782_s21, %s4109_s7 }
  0x19   :  { %p2788_p10 = pnand %p2786_p9, %p2783_p8 }
  0x1b   :  { %2791 = shalt.err (!%p2788_p10)
}
  0x1c   :  { %s2792_s28 = scalar_lea.vmem %s3000_s24, 1024  ;;  %p2797_p12 = scmp.lt.s32.totalorder %s3000_s24, %s3000_s24 }
  0x1d   :  { %p2793_p11 = scmp.ne.s32.totalorder %s3000_s24, %s2792_s28  ;;  %p2798_p13 = scmp.lt.s32.totalorder %s2792_s28, %s2792_s28 }
  0x1f   :  { %p2799_p0 = por %p2798_p13, %p2797_p12 }
  0x21   :  { %p2800_p1 = pnand %p2799_p0, %p2793_p11 }
  0x23   :  { %2803 = shalt.err (!%p2800_p1)
}
  0x24   :  { %78 = dma.hbm_to_vmem [thread:$0]  %s4109_s7, 1024, %s3000_s24, [#allocation9], %s2926_s15, %s2926_s15, %s2927_s16  }
  0x25   :  { %s2928_s29 = smov [#allocation2]   ;;  %s2929_s13 = smov [#allocation7]  }
  0x26   :  { %s36_s30 = sshll.u32 %s2928_s29, 4  ;;  %s60_s14 = sshll.u32 %s2929_s13, 4  ;;  %s37_s30 = int_to_ptr.vmem [resolvable:$true] %s36_s30  ;;  %s3037_s14 = int_to_ptr.vmem [resolvable:$true] %s60_s14 }
  0x27   :  { %s2804_s19 = scalar_lea.hbm %s4106_s4, 2048 }
  0x28   :  { %p2805_p2 = scmp.ne.s32.totalorder %s4106_s4, %s2804_s19  ;;  %p2808_p3 = scmp.lt.u32.totalorder %s2804_s19, %s4106_s4 }
  0x2a   :  { %p2810_p4 = pnand %p2808_p3, %p2805_p2 }
  0x2c   :  { %2813 = shalt.err (!%p2810_p4)
}
  0x2d   :  { %s2814_s7 = scalar_lea.vmem %s37_s30, 2048  ;;  %p2819_p6 = scmp.lt.s32.totalorder %s37_s30, %s37_s30 }
  0x2e   :  { %p2815_p5 = scmp.ne.s32.totalorder %s37_s30, %s2814_s7  ;;  %p2820_p7 = scmp.lt.s32.totalorder %s2814_s7, %s2814_s7 }
  0x30   :  { %p2821_p8 = por %p2820_p7, %p2819_p6 }
  0x32   :  { %p2822_p9 = pnand %p2821_p8, %p2815_p5 }
  0x34   :  { %2825 = shalt.err (!%p2822_p9)
}
  0x35   :  { %42 = dma.hbm_to_vmem [thread:$0]  %s4106_s4, 2048, %s37_s30, [#allocation3], %s2926_s15, %s2926_s15, %s2927_s16  }
  0x36   :  { %s2826_s5 = scalar_lea.hbm %s4108_s6, 2048 }
  0x37   :  { %p2827_p10 = scmp.ne.s32.totalorder %s4108_s6, %s2826_s5  ;;  %p2830_p11 = scmp.lt.u32.totalorder %s2826_s5, %s4108_s6 }
  0x39   :  { %p2832_p12 = pnand %p2830_p11, %p2827_p10 }
  0x3b   :  { %2835 = shalt.err (!%p2832_p12)
}
  0x3c   :  { %s2836_s18 = scalar_lea.vmem %s3037_s14, 2048  ;;  %p2841_p0 = scmp.lt.s32.totalorder %s3037_s14, %s3037_s14 }
  0x3d   :  { %p2837_p13 = scmp.ne.s32.totalorder %s3037_s14, %s2836_s18  ;;  %p2842_p1 = scmp.lt.s32.totalorder %s2836_s18, %s2836_s18 }
  0x3f   :  { %p2843_p2 = por %p2842_p1, %p2841_p0 }
  0x41   :  { %p2844_p3 = pnand %p2843_p2, %p2837_p13 }
  0x43   :  { %2847 = shalt.err (!%p2844_p3)
}
  0x44   :  { %66 = dma.hbm_to_vmem [thread:$0]  %s4108_s6, 2048, %s3037_s14, [#allocation6], %s2926_s15, %s2926_s15, %s2927_s16  }
  0x45   :  { %s2930_s19 = smov [#allocation10]   ;;  %s2848_s25 = scalar_lea.hbm %s4112_s10, 128 }
  0x46   :  { %s89_s20 = sshll.u32 %s2930_s19, 4  ;;  %p2849_p4 = scmp.ne.s32.totalorder %s4112_s10, %s2848_s25  ;;  %s90_s20 = int_to_ptr.vmem [resolvable:$true] %s89_s20 }
  0x47   :  { %p2852_p5 = scmp.lt.u32.totalorder %s2848_s25, %s4112_s10 }
  0x49   :  { %p2854_p6 = pnand %p2852_p5, %p2849_p4 }
  0x4b   :  { %2857 = shalt.err (!%p2854_p6)
}
  0x4c   :  { %s2858_s28 = scalar_lea.vmem %s90_s20, 128  ;;  %p2863_p8 = scmp.lt.s32.totalorder %s90_s20, %s90_s20 }
  0x4d   :  { %p2859_p7 = scmp.ne.s32.totalorder %s90_s20, %s2858_s28  ;;  %p2864_p9 = scmp.lt.s32.totalorder %s2858_s28, %s2858_s28 }
  0x4f   :  { %p2865_p10 = por %p2864_p9, %p2863_p8 }
  0x51   :  { %p2866_p11 = pnand %p2865_p10, %p2859_p7 }
  0x53   :  { %2869 = shalt.err (!%p2866_p11)
}
  0x54   :  { %92 = dma.hbm_to_vmem [thread:$0]  %s4112_s10, 128, %s90_s20, [#allocation9]  }
  0x55   :  { %2914 = dma.done.wait [#allocation3], 2048  }
  0x56   :  { %2915 = vsyncadd [#allocation3], 4294965248 }
  0x57   :  { %2916 = dma.done.wait [#allocation6], 4096  }
  0x58   :  { %2917 = vsyncadd [#allocation6], 4294963200 }
  0x59   :  { %2918 = dma.done.wait [#allocation9], 1152  }
  0x5a   :  { %2919 = vsyncadd [#allocation9], 4294966144  ;;  %v2625_v0 = vld [vmem:[%s4102_s0 + $0x4] ss:$16 sps:$4 sm:$0xff]   ;;  %v2627_v1 = vld [vmem:[%s4102_s0 + $0xc] ss:$16 sps:$4 sm:$0xff]  }
  0x5b   :  { %382 = vmatprep.subr.bf16.mxu0 %v2625_v0  ;;  %v2629_v2 = vld [vmem:[%s4102_s0] ss:$16 sps:$4 sm:$0xff]   ;;  %v2630_v3 = vld [vmem:[%s4102_s0 + $0x8] ss:$16 sps:$4 sm:$0xff]   ;;  %455 = vmatprep.subr.bf16.mxu1 %v2627_v1  ;;  %v2631_v4 = vld [vmem:[%s4102_s0 + $0x24] ss:$16 sps:$4 sm:$0xff]  }
  0x5c   :  { %383 = vmatpush1.bf16.msra.mxu0 %v2629_v2  ;;  %456 = vmatpush1.bf16.msra.mxu1 %v2630_v3  ;;  %v2633_v5 = vld [vmem:[%s4102_s0 + $0x2c] ss:$16 sps:$4 sm:$0xff]   ;;  %v2635_v6 = vld [vmem:[%s4102_s0 + $0x20] ss:$16 sps:$4 sm:$0xff]   ;;  %v2636_v7 = vld [vmem:[%s4102_s0 + $0x28] ss:$16 sps:$4 sm:$0xff]  }
  0x5d   :  { %384 = vmatprep.subr.bf16.mxu0 %v2631_v4  ;;  %457 = vmatprep.subr.bf16.mxu1 %v2633_v5  ;;  %v2637_v8 = vld [vmem:[%s4102_s0 + $0x44] ss:$16 sps:$4 sm:$0xff]   ;;  %v2639_v9 = vld [vmem:[%s4102_s0 + $0x4c] ss:$16 sps:$4 sm:$0xff]   ;;  %v2641_v10 = vld [vmem:[%s4102_s0 + $0x40] ss:$16 sps:$4 sm:$0xff]  }
  0x5e   :  { %v2642_v11 = vld [vmem:[%s4102_s0 + $0x48] ss:$16 sps:$4 sm:$0xff]   ;;  %v2643_v12 = vld [vmem:[%s4102_s0 + $0x64] ss:$16 sps:$4 sm:$0xff]   ;;  %v2645_v13 = vld [vmem:[%s4102_s0 + $0x6c] ss:$16 sps:$4 sm:$0xff]  }
  0x5f   :  { %v2647_v14 = vld [vmem:[%s4102_s0 + $0x60] ss:$16 sps:$4 sm:$0xff]   ;;  %v2648_v15 = vld [vmem:[%s4102_s0 + $0x68] ss:$16 sps:$4 sm:$0xff]   ;;  %v2649_v16 = vld [vmem:[%s4102_s0 + $0x84] ss:$16 sps:$4 sm:$0xff]  }
  0x60   :  { %385 = vmatpush1.bf16.msra.mxu0 %v2635_v6  ;;  %458 = vmatpush1.bf16.msra.mxu1 %v2636_v7  ;;  %v2651_v17 = vld [vmem:[%s4102_s0 + $0x8c] ss:$16 sps:$4 sm:$0xff]   ;;  %v2653_v18 = vld [vmem:[%s4102_s0 + $0x80] ss:$16 sps:$4 sm:$0xff]   ;;  %v2654_v19 = vld [vmem:[%s4102_s0 + $0x88] ss:$16 sps:$4 sm:$0xff]  }
  0x61   :  { %386 = vmatprep.subr.bf16.mxu0 %v2637_v8  ;;  %459 = vmatprep.subr.bf16.mxu1 %v2639_v9  ;;  %v2655_v20 = vld [vmem:[%s4102_s0 + $0xa4] ss:$16 sps:$4 sm:$0xff]   ;;  %v2657_v21 = vld [vmem:[%s4102_s0 + $0xac] ss:$16 sps:$4 sm:$0xff]   ;;  %v2659_v22 = vld [vmem:[%s4102_s0 + $0xa0] ss:$16 sps:$4 sm:$0xff]  }
  0x62   :  { %v2660_v23 = vld [vmem:[%s4102_s0 + $0xa8] ss:$16 sps:$4 sm:$0xff]   ;;  %v2661_v24 = vld [vmem:[%s4102_s0 + $0xc4] ss:$16 sps:$4 sm:$0xff]   ;;  %v2663_v25 = vld [vmem:[%s4102_s0 + $0xcc] ss:$16 sps:$4 sm:$0xff]  }
  0x63   :  { %v2665_v26 = vld [vmem:[%s4102_s0 + $0xc0] ss:$16 sps:$4 sm:$0xff]   ;;  %v2666_v27 = vld [vmem:[%s4102_s0 + $0xc8] ss:$16 sps:$4 sm:$0xff]   ;;  %v2667_v28 = vld [vmem:[%s4102_s0 + $0xe4] ss:$16 sps:$4 sm:$0xff]  }
  0x64   :  { %387 = vmatpush1.bf16.msra.mxu0 %v2641_v10  ;;  %460 = vmatpush1.bf16.msra.mxu1 %v2642_v11  ;;  %v2669_v29 = vld [vmem:[%s4102_s0 + $0xec] ss:$16 sps:$4 sm:$0xff]   ;;  %vm369_vm0 = vcmask 130048   ;;  %v2671_v31 = vld [vmem:[%s4102_s0 + $0xe0] ss:$16 sps:$4 sm:$0xff]   ;;  %vm1133_vm1 = vcmask 1041408  }
  0x65   :  { %388 = vmatprep.subr.bf16.mxu0 %v2643_v12  ;;  %461 = vmatprep.subr.bf16.mxu1 %v2645_v13  ;;  %v2681_v30 = vld [vmem:[%s4104_s2 + $0x4] ss:$8 sps:$4 sm:$0xff]   ;;  %v2672_v32 = vld [vmem:[%s4102_s0 + $0xe8] ss:$16 sps:$4 sm:$0xff]   ;;  %v2677_v39 = vld [vmem:[%s4102_s0 + $0x100] ss:$16 sps:$4 sm:$0xff]  }
  0x66   :  { %2218 = vmatprep.mubr.msk.bf16.mxu0 %vm369_vm0, %v2681_v30  ;;  %2222 = vmatprep.mubr.msk.bf16.mxu1 %vm369_vm0, %v2681_v30  ;;  %v2673_v33 = vld [vmem:[%s4102_s0 + $0x104] ss:$16 sps:$4 sm:$0xff]   ;;  %v2675_v34 = vld [vmem:[%s4102_s0 + $0x10c] ss:$16 sps:$4 sm:$0xff]   ;;  %v2678_v40 = vld [vmem:[%s4102_s0 + $0x108] ss:$16 sps:$4 sm:$0xff]  }
  0x67   :  { %v544_v35 = vld [vmem:[%s4111_s9 + $0x80] sm:$0xff]  ;;  %v545_v36 = vld [vmem:[%s4111_s9 + $0x88] sm:$0xff]  ;;  %v546_v48 = vld [vmem:[%s4111_s9 + $0x90] sm:$0xff]  ;;  %vm1044_vm2 = vcmask 15360   ;;  %s2933_s26 = smov [#allocation12]  }
  0x68   :  { %389 = vmatpush1.bf16.msra.mxu0 %v2647_v14  ;;  %462 = vmatpush1.bf16.msra.mxu1 %v2648_v15  ;;  %v576_v37 = vld [vmem:[%s4111_s9 + $0x180] sm:$0xff]  ;;  %v577_v38 = vld [vmem:[%s4111_s9 + $0x188] sm:$0xff]  ;;  %v3214_v42 = vpack.c.bf16 %v545_v36, %v544_v35  ;;  %v547_v49 = vld [vmem:[%s4111_s9 + $0x98] sm:$0xff]  ;;  %s2159_s27 = sshll.u32 %s2933_s26, 4  ;;  %s2160_s27 = int_to_ptr.vmem [resolvable:$true] %s2159_s27 }
  0x69   :  { %390 = vmatprep.subr.bf16.mxu0 %v2649_v16  ;;  %463 = vmatprep.subr.bf16.mxu1 %v2651_v17  ;;  %v2679_v41 = vld [vmem:[%s4104_s2] ss:$8 sps:$4 sm:$0xff]   ;;  %v3216_v43 = vpack.c.bf16 %v577_v38, %v576_v37  ;;  %v578_v50 = vld [vmem:[%s4111_s9 + $0x190] sm:$0xff]  ;;  %v579_v51 = vld [vmem:[%s4111_s9 + $0x198] sm:$0xff]  ;;  %v3257_v57 = vpack.c.bf16 %v547_v49, %v546_v48  ;;  %s2870_s6 = scalar_lea.vmem %s2160_s27, 512  ;;  %p2875_p13 = scmp.lt.s32.totalorder %s2160_s27, %s2160_s27 }
  0x6a   :  { %v528_v44 = vld [vmem:[%s4111_s9] sm:$0xff]  ;;  %v529_v45 = vld [vmem:[%s4111_s9 + $0x8] sm:$0xff]  ;;  %v2682_v52 = vld [vmem:[%s4104_s2 + $0x14] ss:$8 sps:$4 sm:$0xff]   ;;  %v3259_v58 = vpack.c.bf16 %v579_v51, %v578_v50  ;;  %p2871_p12 = scmp.ne.s32.totalorder %s2160_s27, %s2870_s6  ;;  %p2876_p0 = scmp.lt.s32.totalorder %s2870_s6, %s2870_s6 }
  0x6b   :  { %v560_v46 = vld [vmem:[%s4111_s9 + $0x100] sm:$0xff]  ;;  %v561_v47 = vld [vmem:[%s4111_s9 + $0x108] sm:$0xff]  ;;  %v3247_v53 = vpack.c.bf16 %v529_v45, %v528_v44  ;;  %v530_v55 = vld [vmem:[%s4111_s9 + $0x10] sm:$0xff] }
  0x6c   :  { %391 = vmatpush1.bf16.msra.mxu0 %v2653_v18  ;;  %464 = vmatpush1.bf16.msra.mxu1 %v2654_v19  ;;  %v3249_v54 = vpack.c.bf16 %v561_v47, %v560_v46  ;;  %v531_v56 = vld [vmem:[%s4111_s9 + $0x18] sm:$0xff]  ;;  %v562_v59 = vld [vmem:[%s4111_s9 + $0x110] sm:$0xff]  ;;  %v548_v61 = vld [vmem:[%s4111_s9 + $0xa0] sm:$0xff]  ;;  %p2877_p1 = por %p2876_p0, %p2875_p13 }
  0x6d   :  { %392 = vmatprep.subr.bf16.mxu0 %v2655_v20  ;;  %465 = vmatprep.subr.bf16.mxu1 %v2657_v21  ;;  %v563_v60 = vld [vmem:[%s4111_s9 + $0x118] sm:$0xff]  ;;  %v549_v62 = vld [vmem:[%s4111_s9 + $0xa8] sm:$0xff]  ;;  %v580_v63 = vld [vmem:[%s4111_s9 + $0x1a0] sm:$0xff]  ;;  %v3286_v2 = vpack.c.bf16 %v531_v56, %v530_v55 }
  0x6e   :  { %v581_v0 = vld [vmem:[%s4111_s9 + $0x1a8] sm:$0xff]  ;;  %v2684_v1 = vld [vmem:[%s4104_s2 + $0x10] ss:$8 sps:$4 sm:$0xff]   ;;  %v3288_v3 = vpack.c.bf16 %v563_v60, %v562_v59  ;;  %v532_v4 = vld [vmem:[%s4111_s9 + $0x20] sm:$0xff]  ;;  %v3298_v6 = vpack.c.bf16 %v549_v62, %v548_v61  ;;  %p2878_p2 = pnand %p2877_p1, %p2871_p12 }
  0x6f   :  { %v533_v5 = vld [vmem:[%s4111_s9 + $0x28] sm:$0xff]  ;;  %v3300_v7 = vpack.c.bf16 %v581_v0, %v580_v63  ;;  %v564_v8 = vld [vmem:[%s4111_s9 + $0x120] sm:$0xff]  ;;  %v550_v10 = vld [vmem:[%s4111_s9 + $0xb0] sm:$0xff] }
  0x70   :  { %393 = vmatpush1.bf16.msra.mxu0 %v2659_v22  ;;  %466 = vmatpush1.bf16.msra.mxu1 %v2660_v23  ;;  %v565_v9 = vld [vmem:[%s4111_s9 + $0x128] sm:$0xff]  ;;  %v551_v11 = vld [vmem:[%s4111_s9 + $0xb8] sm:$0xff]  ;;  %v582_v12 = vld [vmem:[%s4111_s9 + $0x1b0] sm:$0xff]  ;;  %v3325_v15 = vpack.c.bf16 %v533_v5, %v532_v4 }
  0x71   :  { %394 = vmatprep.subr.bf16.mxu0 %v2661_v24  ;;  %467 = vmatprep.subr.bf16.mxu1 %v2663_v25  ;;  %v583_v13 = vld [vmem:[%s4111_s9 + $0x1b8] sm:$0xff]  ;;  %v2685_v14 = vld [vmem:[%s4104_s2 + $0x24] ss:$8 sps:$4 sm:$0xff]   ;;  %v3327_v16 = vpack.c.bf16 %v565_v9, %v564_v8  ;;  %v534_v17 = vld [vmem:[%s4111_s9 + $0x30] sm:$0xff]  ;;  %v3337_v19 = vpack.c.bf16 %v551_v11, %v550_v10 }
  0x72   :  { %v535_v18 = vld [vmem:[%s4111_s9 + $0x38] sm:$0xff]  ;;  %v3339_v20 = vpack.c.bf16 %v583_v13, %v582_v12  ;;  %v566_v21 = vld [vmem:[%s4111_s9 + $0x130] sm:$0xff]  ;;  %v552_v23 = vld [vmem:[%s4111_s9 + $0xc0] sm:$0xff] }
  0x73   :  { %v567_v22 = vld [vmem:[%s4111_s9 + $0x138] sm:$0xff]  ;;  %v553_v24 = vld [vmem:[%s4111_s9 + $0xc8] sm:$0xff]  ;;  %v584_v25 = vld [vmem:[%s4111_s9 + $0x1c0] sm:$0xff] }
  0x74   :  { %395 = vmatpush1.bf16.msra.mxu0 %v2665_v26  ;;  %468 = vmatpush1.bf16.msra.mxu1 %v2666_v27  ;;  %v585_v26 = vld [vmem:[%s4111_s9 + $0x1c8] sm:$0xff]  ;;  %v536_v30 = vld [vmem:[%s4111_s9 + $0x40] sm:$0xff]  ;;  %v554_v36 = vld [vmem:[%s4111_s9 + $0xd0] sm:$0xff] }
  0x75   :  { %396 = vmatprep.subr.bf16.mxu0 %v2667_v28  ;;  %469 = vmatprep.subr.bf16.mxu1 %v2669_v29  ;;  %v2687_v27 = vld [vmem:[%s4104_s2 + $0x20] ss:$8 sps:$4 sm:$0xff]   ;;  %v3366_v28 = vpack.c.bf16 %v535_v18, %v534_v17  ;;  %v3368_v29 = vpack.c.bf16 %v567_v22, %v566_v21  ;;  %v555_v37 = vld [vmem:[%s4111_s9 + $0xd8] sm:$0xff]  ;;  %v586_v38 = vld [vmem:[%s4111_s9 + $0x1d0] sm:$0xff] }
  0x76   :  { %v569_v35 = vld [vmem:[%s4111_s9 + $0x148] sm:$0xff]  ;;  %v538_v45 = vld [vmem:[%s4111_s9 + $0x50] sm:$0xff]  ;;  %v539_v46 = vld [vmem:[%s4111_s9 + $0x58] sm:$0xff]  ;;  %v3417_v47 = vpack.c.bf16 %v555_v37, %v554_v36 }
  0x77   :  { %v570_v49 = vld [vmem:[%s4111_s9 + $0x150] sm:$0xff]  ;;  %v571_v50 = vld [vmem:[%s4111_s9 + $0x158] sm:$0xff]  ;;  %v556_v51 = vld [vmem:[%s4111_s9 + $0xe0] sm:$0xff]  ;;  %v3446_v60 = vpack.c.bf16 %v539_v46, %v538_v45 }
  0x78   :  { %397 = vmatpush1.bf16.msra.mxu0 %v2671_v31  ;;  %470 = vmatpush1.bf16.msra.mxu1 %v2672_v32  ;;  %v537_v31 = vld [vmem:[%s4111_s9 + $0x48] sm:$0xff]  ;;  %v3378_v32 = vpack.c.bf16 %v553_v24, %v552_v23  ;;  %v588_v55 = vld [vmem:[%s4111_s9 + $0x1e0] sm:$0xff]  ;;  %v2690_v59 = vld [vmem:[%s4104_s2 + $0x30] ss:$8 sps:$4 sm:$0xff]   ;;  %v3448_v61 = vpack.c.bf16 %v571_v50, %v570_v49 }
  0x79   :  { %398 = vmatprep.subr.bf16.mxu0 %v2673_v33  ;;  %471 = vmatprep.subr.bf16.mxu1 %v2675_v34  ;;  %v3380_v33 = vpack.c.bf16 %v585_v26, %v584_v25  ;;  %v568_v34 = vld [vmem:[%s4111_s9 + $0x140] sm:$0xff]  ;;  %v589_v56 = vld [vmem:[%s4111_s9 + $0x1e8] sm:$0xff]  ;;  %v558_v8 = vld [vmem:[%s4111_s9 + $0xf0] sm:$0xff] }
  0x7a   :  { %v3407_v44 = vpack.c.bf16 %v569_v35, %v568_v34  ;;  %v540_v62 = vld [vmem:[%s4111_s9 + $0x60] sm:$0xff]  ;;  %v541_v63 = vld [vmem:[%s4111_s9 + $0x68] sm:$0xff]  ;;  %v559_v9 = vld [vmem:[%s4111_s9 + $0xf8] sm:$0xff] }
  0x7b   :  { %v572_v4 = vld [vmem:[%s4111_s9 + $0x160] sm:$0xff]  ;;  %v573_v5 = vld [vmem:[%s4111_s9 + $0x168] sm:$0xff]  ;;  %v590_v10 = vld [vmem:[%s4111_s9 + $0x1f0] sm:$0xff]  ;;  %v3482_v12 = vpack.c.bf16 %v541_v63, %v540_v62  ;;  %v3491_v17 = vpack.c.bf16 %v559_v9, %v558_v8 }
  0x7c   :  { %399 = vmatpush1.bf16.msra.mxu0 %v2677_v39  ;;  %472 = vmatpush1.bf16.msra.mxu1 %v2678_v40  ;;  %v587_v39 = vld [vmem:[%s4111_s9 + $0x1d8] sm:$0xff]  ;;  %v3484_v13 = vpack.c.bf16 %v573_v5, %v572_v4  ;;  %v574_v22 = vld [vmem:[%s4111_s9 + $0x170] sm:$0xff] }
  0x7d   :  { %2487 = vmatprep.subr.bf16.mxu0 %v3214_v42  ;;  %2519 = vmatprep.subr.bf16.mxu1 %v3216_v43  ;;  %v2688_v40 = vld [vmem:[%s4104_s2 + $0x34] ss:$8 sps:$4 sm:$0xff]   ;;  %v3419_v48 = vpack.c.bf16 %v587_v39, %v586_v38 }
  0x7e   :  { %v591_v11 = vld [vmem:[%s4111_s9 + $0x1f8] sm:$0xff] }
  0x7f   :  { %415 = vmatmul.mubr.bf16.vlgmr.msra.gmra.mrb[0].mxu0 %v2679_v41  ;;  %488 = vmatmul.mubr.bf16.vlgmr.msra.gmra.mrb[0].mxu1 %v2679_v41  ;;  %v3405_v41 = vpack.c.bf16 %v537_v31, %v536_v30  ;;  %v3493_v18 = vpack.c.bf16 %v591_v11, %v590_v10  ;;  %v543_v21 = vld [vmem:[%s4111_s9 + $0x78] sm:$0xff] }
  0x80   :  { %2219 = vmatprep.mubr.msk.bf16.mxu0 %vm369_vm0, %v2682_v52  ;;  %2223 = vmatprep.mubr.msk.bf16.mxu1 %vm369_vm0, %v2682_v52  ;;  %v557_v52 = vld [vmem:[%s4111_s9 + $0xe8] sm:$0xff]  ;;  %v575_v23 = vld [vmem:[%s4111_s9 + $0x178] sm:$0xff] }
  0x81   :  { %2489 = vmatpush3.bf16.msra.mxu0 %v3247_v53  ;;  %2521 = vmatpush3.bf16.msra.mxu1 %v3249_v54  ;;  %v3458_v0 = vpack.c.bf16 %v557_v52, %v556_v51  ;;  %v3508_v25 = vpack.c.bf16 %v575_v23, %v574_v22 }
  0x82   :  { %2491 = vmatprep.subr.bf16.mxu0 %v3257_v57  ;;  %2523 = vmatprep.subr.bf16.mxu1 %v3259_v58 }
  0x85   :  { %2493 = vmatpush3.bf16.msra.mxu0 %v3286_v2  ;;  %2525 = vmatpush3.bf16.msra.mxu1 %v3288_v3 }
  0x86   :  { %2495 = vmatprep.subr.bf16.mxu0 %v3298_v6  ;;  %2527 = vmatprep.subr.bf16.mxu1 %v3300_v7 }
  0x87   :  { %425 = vmatmul.mubr.bf16.gmra.mrb[4].mxu0 %v2684_v1  ;;  %498 = vmatmul.mubr.bf16.gmra.mrb[4].mxu1 %v2684_v1  ;;  %v3460_v1 = vpack.c.bf16 %v589_v56, %v588_v55 }
  0x88   :  { %2220 = vmatprep.mubr.msk.bf16.mxu0 %vm369_vm0, %v2685_v14  ;;  %2224 = vmatprep.mubr.msk.bf16.mxu1 %vm369_vm0, %v2685_v14  ;;  %v542_v14 = vld [vmem:[%s4111_s9 + $0x70] sm:$0xff] }
  0x89   :  { %2497 = vmatpush3.bf16.msra.mxu0 %v3325_v15  ;;  %2529 = vmatpush3.bf16.msra.mxu1 %v3327_v16  ;;  %v3506_v24 = vpack.c.bf16 %v543_v21, %v542_v14 }
  0x8a   :  { %2499 = vmatprep.subr.bf16.mxu0 %v3337_v19  ;;  %2531 = vmatprep.subr.bf16.mxu1 %v3339_v20 }
  0x8d   :  { %2501 = vmatpush3.bf16.msra.mxu0 %v3366_v28  ;;  %2533 = vmatpush3.bf16.msra.mxu1 %v3368_v29 }
  0x8e   :  { %2503 = vmatprep.subr.bf16.mxu0 %v3378_v32  ;;  %2535 = vmatprep.subr.bf16.mxu1 %v3380_v33 }
  0x8f   :  { %435 = vmatmul.mubr.bf16.gmra.mrb[8].mxu0 %v2687_v27  ;;  %508 = vmatmul.mubr.bf16.gmra.mrb[8].mxu1 %v2687_v27 }
  0x90   :  { %2221 = vmatprep.mubr.msk.bf16.mxu0 %vm369_vm0, %v2688_v40  ;;  %2225 = vmatprep.mubr.msk.bf16.mxu1 %vm369_vm0, %v2688_v40 }
  0x91   :  { %2505 = vmatpush3.bf16.msra.mxu0 %v3405_v41  ;;  %2537 = vmatpush3.bf16.msra.mxu1 %v3407_v44 }
  0x92   :  { %2507 = vmatprep.subr.bf16.mxu0 %v3417_v47  ;;  %2539 = vmatprep.subr.bf16.mxu1 %v3419_v48 }
  0x95   :  { %2509 = vmatpush3.bf16.msra.mxu0 %v3446_v60  ;;  %2541 = vmatpush3.bf16.msra.mxu1 %v3448_v61 }
  0x96   :  { %2511 = vmatprep.subr.bf16.mxu0 %v3458_v0  ;;  %2543 = vmatprep.subr.bf16.mxu1 %v3460_v1 }
  0x97   :  { %445 = vmatmul.mubr.bf16.gmra.mrb[12].mxu0 %v2690_v59  ;;  %518 = vmatmul.mubr.bf16.gmra.mrb[12].mxu1 %v2690_v59 }
  0x99   :  { %2513 = vmatpush3.bf16.msra.mxu0 %v3482_v12  ;;  %2545 = vmatpush3.bf16.msra.mxu1 %v3484_v13 }
  0x9a   :  { %2515 = vmatprep.subr.bf16.mxu0 %v3491_v17  ;;  %2547 = vmatprep.subr.bf16.mxu1 %v3493_v18 }
  0x9d   :  { %2517 = vmatpush3.bf16.msra.mxu0 %v3506_v24  ;;  %2549 = vmatpush3.bf16.msra.mxu1 %v3508_v25 }
  0x9e   :  { %2551 = vmatprep.subr.bf16.mxu0 %v3214_v42  ;;  %2583 = vmatprep.subr.bf16.mxu1 %v3216_v43 }
 0x152   :  { %v3516_v26 = vpop.f32.mrb[0].mxu0  ;;  %v3518_v27 = vpop.f32.mrb[0].mxu1 }
 0x153   :  { %v3520_v30 = vpop.f32.mrb[1].mxu0  ;;  %v3522_v31 = vpop.f32.mrb[1].mxu1  ;;  %v804_v49 = vmul.f32 %v3518_v27, %v3518_v27 }
 0x154   :  { %v3524_v34 = vpop.f32.mrb[2].mxu0  ;;  %v3526_v35 = vpop.f32.mrb[2].mxu1  ;;  %656 = vmatprep.mubr.f32.mxu0 %v3520_v30  ;;  %761 = vmatprep.mubr.f32.mxu1 %v3522_v31  ;;  %v803_v46 = vmul.f32 %v3520_v30, %v3520_v30 }
 0x155   :  { %v3530_v36 = vpop.f32.mrb[3].mxu0  ;;  %v3532_v42 = vpop.f32.mrb[3].mxu1  ;;  %657 = vmatmul.mubr.f32.vlgmr.msra.gmra.mrb[16].mxu0 %v3516_v26  ;;  %762 = vmatmul.mubr.f32.vlgmr.msra.gmra.mrb[16].mxu1 %v3518_v27  ;;  %v806_v52 = vmul.f32 %v3524_v34, %v3524_v34  ;;  %v808_v55 = vmul.f32 %v3526_v35, %v3526_v35 }
 0x156   :  { %2553 = vmatpush3.bf16.msra.mxu0 %v3247_v53  ;;  %2585 = vmatpush3.bf16.msra.mxu1 %v3249_v54  ;;  %v807_v50 = vmul.f32 %v3530_v36, %v3530_v36  ;;  %v809_v51 = vmul.f32 %v3532_v42, %v3532_v42 }
 0x157   :  { %661 = vmatprep.mubr.f32.mxu0 %v3530_v36  ;;  %766 = vmatprep.mubr.f32.mxu1 %v3532_v42 }
 0x158   :  { %2555 = vmatprep.subr.bf16.mxu0 %v3257_v57  ;;  %2587 = vmatprep.subr.bf16.mxu1 %v3259_v58 }
 0x159   :  { %662 = vmatmul.mubr.f32.gmra.mrb[18].mxu0 %v3524_v34  ;;  %767 = vmatmul.mubr.f32.gmra.mrb[18].mxu1 %v3526_v35 }
 0x15a   :  { %2557 = vmatpush3.bf16.msra.mxu0 %v3286_v2  ;;  %2589 = vmatpush3.bf16.msra.mxu1 %v3288_v3  ;;  %v3546_v43 = vpop.f32.mrb[4].mxu0  ;;  %v3548_v53 = vpop.f32.mrb[4].mxu1 }
 0x15b   :  { %v3550_v54 = vpop.f32.mrb[5].mxu0  ;;  %v3552_v37 = vpop.f32.mrb[5].mxu1  ;;  %2559 = vmatprep.subr.bf16.mxu0 %v3298_v6  ;;  %2591 = vmatprep.subr.bf16.mxu1 %v3300_v7 }
 0x15c   :  { %v3556_v57 = vpop.f32.mrb[6].mxu0  ;;  %v3558_v58 = vpop.f32.mrb[6].mxu1  ;;  %666 = vmatprep.mubr.f32.mxu0 %v3550_v54  ;;  %771 = vmatprep.mubr.f32.mxu1 %v3552_v37  ;;  %v811_v56 = vmul.f32 %v3550_v54, %v3550_v54  ;;  %v813_v59 = vmul.f32 %v3552_v37, %v3552_v37 }
 0x15d   :  { %v3562_v2 = vpop.f32.mrb[7].mxu0  ;;  %v3564_v3 = vpop.f32.mrb[7].mxu1  ;;  %667 = vmatmul.mubr.f32.gmra.mrb[20].mxu0 %v3546_v43  ;;  %772 = vmatmul.mubr.f32.gmra.mrb[20].mxu1 %v3548_v53 }
 0x15e   :  { %2561 = vmatpush3.bf16.msra.mxu0 %v3325_v15  ;;  %2593 = vmatpush3.bf16.msra.mxu1 %v3327_v16  ;;  %v815_v62 = vmul.f32 %v3562_v2, %v3562_v2  ;;  %v817_v63 = vmul.f32 %v3564_v3, %v3564_v3 }
 0x15f   :  { %671 = vmatprep.mubr.f32.mxu0 %v3562_v2  ;;  %776 = vmatprep.mubr.f32.mxu1 %v3564_v3 }
 0x160   :  { %2563 = vmatprep.subr.bf16.mxu0 %v3337_v19  ;;  %2595 = vmatprep.subr.bf16.mxu1 %v3339_v20 }
 0x161   :  { %672 = vmatmul.mubr.f32.gmra.mrb[22].mxu0 %v3556_v57  ;;  %777 = vmatmul.mubr.f32.gmra.mrb[22].mxu1 %v3558_v58 }
 0x162   :  { %2565 = vmatpush3.bf16.msra.mxu0 %v3366_v28  ;;  %2597 = vmatpush3.bf16.msra.mxu1 %v3368_v29  ;;  %v3578_v6 = vpop.f32.mrb[8].mxu0  ;;  %v3580_v7 = vpop.f32.mrb[8].mxu1 }
 0x163   :  { %v3582_v15 = vpop.f32.mrb[9].mxu0  ;;  %v3584_v16 = vpop.f32.mrb[9].mxu1  ;;  %2567 = vmatprep.subr.bf16.mxu0 %v3378_v32  ;;  %2599 = vmatprep.subr.bf16.mxu1 %v3380_v33  ;;  %v818_v8 = vmul.f32 %v3578_v6, %v3578_v6  ;;  %v820_v9 = vmul.f32 %v3580_v7, %v3580_v7 }
 0x164   :  { %4128 = vst [vmem:[#allocation19_spill] sm:$0xff] %v3584_v16  ;;  %v3588_v19 = vpop.f32.mrb[10].mxu0  ;;  %v3590_v20 = vpop.f32.mrb[10].mxu1  ;;  %676 = vmatprep.mubr.f32.mxu0 %v3582_v15  ;;  %781 = vmatprep.mubr.f32.mxu1 %v3584_v16  ;;  %v819_v4 = vmul.f32 %v3582_v15, %v3582_v15  ;;  %v821_v5 = vmul.f32 %v3584_v16, %v3584_v16 }
 0x165   :  { %v3594_v28 = vpop.f32.mrb[11].mxu0  ;;  %v3596_v29 = vpop.f32.mrb[11].mxu1  ;;  %677 = vmatmul.mubr.f32.gmra.mrb[24].mxu0 %v3578_v6  ;;  %782 = vmatmul.mubr.f32.gmra.mrb[24].mxu1 %v3580_v7 }
 0x166   :  { %4129 = vst [vmem:[#allocation20_spill] sm:$0xff] %v3594_v28  ;;  %4130 = vst [vmem:[#allocation21_spill] sm:$0xff] %v3596_v29  ;;  %2569 = vmatpush3.bf16.msra.mxu0 %v3405_v41  ;;  %2601 = vmatpush3.bf16.msra.mxu1 %v3407_v44  ;;  %v823_v10 = vmul.f32 %v3594_v28, %v3594_v28  ;;  %v825_v11 = vmul.f32 %v3596_v29, %v3596_v29 }
 0x167   :  { %681 = vmatprep.mubr.f32.mxu0 %v3594_v28  ;;  %786 = vmatprep.mubr.f32.mxu1 %v3596_v29 }
 0x168   :  { %2571 = vmatprep.subr.bf16.mxu0 %v3417_v47  ;;  %2603 = vmatprep.subr.bf16.mxu1 %v3419_v48  ;;  %v805_v47 = vmul.f32 %v3522_v31, %v3522_v31  ;;  %v802_v48 = vmul.f32 %v3516_v26, %v3516_v26 }
 0x169   :  { %682 = vmatmul.mubr.f32.gmra.mrb[26].mxu0 %v3588_v19  ;;  %787 = vmatmul.mubr.f32.gmra.mrb[26].mxu1 %v3590_v20 }
 0x16a   :  { %2573 = vmatpush3.bf16.msra.mxu0 %v3446_v60  ;;  %2605 = vmatpush3.bf16.msra.mxu1 %v3448_v61  ;;  %v3610_v32 = vpop.f32.mrb[12].mxu0  ;;  %v3612_v33 = vpop.f32.mrb[12].mxu1  ;;  %v810_v60 = vmul.f32 %v3546_v43, %v3546_v43  ;;  %v812_v61 = vmul.f32 %v3548_v53, %v3548_v53 }
 0x16b   :  { %v3614_v38 = vpop.f32.mrb[13].mxu0  ;;  %v3616_v39 = vpop.f32.mrb[13].mxu1  ;;  %2575 = vmatprep.subr.bf16.mxu0 %v3458_v0  ;;  %2607 = vmatprep.subr.bf16.mxu1 %v3460_v1  ;;  %v814_v0 = vmul.f32 %v3556_v57, %v3556_v57  ;;  %v816_v1 = vmul.f32 %v3558_v58, %v3558_v58  ;;  %v828_v21 = vmul.f32 %v3612_v33, %v3612_v33 }
 0x16c   :  { %4131 = vst [vmem:[#allocation22_spill] sm:$0xff] %v3614_v38  ;;  %4132 = vst [vmem:[#allocation23_spill] sm:$0xff] %v3616_v39  ;;  %v3620_v40 = vpop.f32.mrb[14].mxu0  ;;  %v3622_v41 = vpop.f32.mrb[14].mxu1  ;;  %686 = vmatprep.mubr.f32.mxu0 %v3614_v38  ;;  %791 = vmatprep.mubr.f32.mxu1 %v3616_v39  ;;  %v827_v14 = vmul.f32 %v3614_v38, %v3614_v38 }
 0x16d   :  { %v3626_v44 = vpop.f32.mrb[15].mxu0  ;;  %v3628_v45 = vpop.f32.mrb[15].mxu1  ;;  %687 = vmatmul.mubr.f32.gmra.mrb[28].mxu0 %v3610_v32  ;;  %792 = vmatmul.mubr.f32.gmra.mrb[28].mxu1 %v3612_v33 }
 0x16e   :  { %4133 = vst [vmem:[#allocation24_spill] sm:$0xff] %v3626_v44  ;;  %4134 = vst [vmem:[#allocation25_spill] sm:$0xff] %v3628_v45  ;;  %2577 = vmatpush3.bf16.msra.mxu0 %v3482_v12  ;;  %2609 = vmatpush3.bf16.msra.mxu1 %v3484_v13  ;;  %v822_v12 = vmul.f32 %v3588_v19, %v3588_v19  ;;  %v824_v13 = vmul.f32 %v3590_v20, %v3590_v20 }
 0x16f   :  { %691 = vmatprep.mubr.f32.mxu0 %v3626_v44  ;;  %796 = vmatprep.mubr.f32.mxu1 %v3628_v45  ;;  %v831_v22 = vmul.f32 %v3626_v44, %v3626_v44  ;;  %v833_v23 = vmul.f32 %v3628_v45, %v3628_v45  ;;  %v1833_v44 = vld [vmem:[#allocation2 + $0x70] sm:$0xff] }
 0x170   :  { %2579 = vmatprep.subr.bf16.mxu0 %v3491_v17  ;;  %2611 = vmatprep.subr.bf16.mxu1 %v3493_v18  ;;  %v829_v17 = vmul.f32 %v3616_v39, %v3616_v39  ;;  %v826_v18 = vmul.f32 %v3610_v32, %v3610_v32 }
 0x171   :  { %692 = vmatmul.mubr.f32.gmra.mrb[30].mxu0 %v3620_v40  ;;  %797 = vmatmul.mubr.f32.gmra.mrb[30].mxu1 %v3622_v41 }
 0x172   :  { %2581 = vmatpush3.bf16.msra.mxu0 %v3506_v24  ;;  %2613 = vmatpush3.bf16.msra.mxu1 %v3508_v25  ;;  %v830_v24 = vmul.f32 %v3620_v40, %v3620_v40  ;;  %v832_v25 = vmul.f32 %v3622_v41, %v3622_v41 }
 0x173   :  { %898 = vmatprep.mubr.f32.mxu0 %v803_v46  ;;  %1003 = vmatprep.mubr.f32.mxu1 %v805_v47  ;;  %v1111_v46 = vld [vmem:[#allocation10] sm:$0xff]  ;;  %v2931_v47 = vmov 1983009808  }
 0x175   :  { %899 = vmatmul.mubr.f32.vlgmr.msra.gmra.mrb[32].mxu0 %v802_v48  ;;  %1004 = vmatmul.mubr.f32.vlgmr.msra.gmra.mrb[32].mxu1 %v804_v49  ;;  %v1115_v48 = vunpack.c.l.s4 %v2931_v47  ;;  %v1117_v49 = vlaneseq }
 0x176   :  { %903 = vmatprep.mubr.f32.mxu0 %v807_v50  ;;  %1008 = vmatprep.mubr.f32.mxu1 %v809_v51 }
 0x177   :  { %v1116_v50 = vunpack.c.0.s8 %v1115_v48  ;;  %v3706_v51 = vshrl.u32 %v1117_v49, 7 }
 0x179   :  { %904 = vmatmul.mubr.f32.gmra.mrb[34].mxu0 %v806_v52  ;;  %1009 = vmatmul.mubr.f32.gmra.mrb[34].mxu1 %v808_v55  ;;  %v1113_v52 = vcombine.high %v1111_v46, %v1111_v46  ;;  %v1119_v55 = vsub.s32 %v1116_v50, %v3706_v51 }
 0x17a   :  { %908 = vmatprep.mubr.f32.mxu0 %v811_v56  ;;  %1013 = vmatprep.mubr.f32.mxu1 %v813_v59 }
 0x17b   :  { %v3709_v56 = vrot.slane %v1111_v46, %v1119_v55  ;;  %v3711_v59 = vrot.slane %v1113_v52, %v1119_v55 }
 0x17d   :  { %909 = vmatmul.mubr.f32.gmra.mrb[36].mxu0 %v810_v60  ;;  %1014 = vmatmul.mubr.f32.gmra.mrb[36].mxu1 %v812_v61  ;;  %v3715_v60 = vcombine.high %v3709_v56, %v3709_v56  ;;  %v3719_v61 = vcombine.high %v3711_v59, %v3711_v59 }
 0x17e   :  { %913 = vmatprep.mubr.f32.mxu0 %v815_v62  ;;  %1018 = vmatprep.mubr.f32.mxu1 %v817_v63  ;;  %v4115_v62 = vmov 0.0  }
 0x17f   :  { %2226 = vmatprep.subr.msk.mxu0 %vm1133_vm1, %v3715_v60  ;;  %2229 = vmatprep.subr.msk.mxu1 %vm1133_vm1, %v3719_v61 }
 0x180   :  { %2227 = vmatpush1.msk.msra.mxu0 %vm1133_vm1, %v3709_v56  ;;  %2230 = vmatpush1.msk.msra.mxu1 %vm1133_vm1, %v3711_v59 }
 0x181   :  { %914 = vmatmul.mubr.f32.gmra.mrb[38].mxu0 %v814_v0  ;;  %1019 = vmatmul.mubr.f32.gmra.mrb[38].mxu1 %v816_v1 }
 0x182   :  { %918 = vmatprep.mubr.f32.mxu0 %v819_v4  ;;  %1023 = vmatprep.mubr.f32.mxu1 %v821_v5 }
 0x183   :  { %2232 = vmatprep.subr.msk.mxu0 %vm1133_vm1, %v3715_v60  ;;  %2235 = vmatprep.subr.msk.mxu1 %vm1133_vm1, %v3719_v61 }
 0x185   :  { %919 = vmatmul.mubr.f32.gmra.mrb[40].mxu0 %v818_v8  ;;  %1024 = vmatmul.mubr.f32.gmra.mrb[40].mxu1 %v820_v9 }
 0x186   :  { %923 = vmatprep.mubr.f32.mxu0 %v823_v10  ;;  %1028 = vmatprep.mubr.f32.mxu1 %v825_v11 }
 0x189   :  { %924 = vmatmul.mubr.f32.gmra.mrb[42].mxu0 %v822_v12  ;;  %1029 = vmatmul.mubr.f32.gmra.mrb[42].mxu1 %v824_v13 }
 0x18a   :  { %928 = vmatprep.mubr.f32.mxu0 %v827_v14  ;;  %1033 = vmatprep.mubr.f32.mxu1 %v829_v17 }
 0x18d   :  { %929 = vmatmul.mubr.f32.gmra.mrb[44].mxu0 %v826_v18  ;;  %1034 = vmatmul.mubr.f32.gmra.mrb[44].mxu1 %v828_v21 }
 0x18e   :  { %933 = vmatprep.mubr.f32.mxu0 %v831_v22  ;;  %1038 = vmatprep.mubr.f32.mxu1 %v833_v23 }
 0x191   :  { %934 = vmatmul.mubr.f32.gmra.mrb[46].mxu0 %v830_v24  ;;  %1039 = vmatmul.mubr.f32.gmra.mrb[46].mxu1 %v832_v25 }
 0x192   :  { %1206 = vmatprep.mubr.f32.mxu0 %v4115_v62  ;;  %1277 = vmatprep.mubr.f32.mxu1 %v4115_v62 }
 0x228   :  { %v2294_v63 = vpop.f32.mrb[16].mxu0  ;;  %v2350_v0 = vpop.f32.mrb[16].mxu1 }
 0x229   :  { %v2295_v1 = vpop.f32.mrb[17].mxu0  ;;  %v2351_v4 = vpop.f32.mrb[17].mxu1 }
 0x22a   :  { %v2296_v5 = vadd.f32 %v2295_v1, %v2294_v63  ;;  %v2352_v8 = vadd.f32 %v2351_v4, %v2350_v0 }
 0x22c   :  { %v764_v9 = vadd.f32 %v2352_v8, %v2296_v5  ;;  %v2297_v10 = vpop.f32.mrb[18].mxu0  ;;  %v2353_v11 = vpop.f32.mrb[18].mxu1 }
 0x22d   :  { %v2298_v12 = vpop.f32.mrb[19].mxu0  ;;  %v2354_v13 = vpop.f32.mrb[19].mxu1 }
 0x22e   :  { %v2299_v14 = vadd.f32 %v2298_v12, %v2297_v10  ;;  %v2355_v17 = vadd.f32 %v2354_v13, %v2353_v11  ;;  %v1045_v25 = vsel %vm1044_vm2, %v764_v9, 0.0 }
 0x230   :  { %v769_v18 = vadd.f32 %v2355_v17, %v2299_v14  ;;  %v2300_v21 = vpop.f32.mrb[20].mxu0  ;;  %v2356_v22 = vpop.f32.mrb[20].mxu1 }
 0x231   :  { %v2301_v23 = vpop.f32.mrb[21].mxu0  ;;  %v2357_v24 = vpop.f32.mrb[21].mxu1 }
 0x232   :  { %v1046_v46 = vsel %vm1044_vm2, %v769_v18, 0.0  ;;  %v2302_v47 = vadd.f32 %v2301_v23, %v2300_v21  ;;  %v2358_v48 = vadd.f32 %v2357_v24, %v2356_v22 }
 0x233   :  { %v1047_v49 = vadd.f32 %v1046_v46, %v1045_v25 }
 0x234   :  { %v774_v50 = vadd.f32 %v2358_v48, %v2302_v47  ;;  %v2303_v52 = vpop.f32.mrb[22].mxu0  ;;  %v2359_v55 = vpop.f32.mrb[22].mxu1 }
 0x235   :  { %v2304_v63 = vpop.f32.mrb[23].mxu0  ;;  %v2360_v0 = vpop.f32.mrb[23].mxu1 }
 0x236   :  { %v1048_v1 = vsel %vm1044_vm2, %v774_v50, 0.0  ;;  %v2305_v4 = vadd.f32 %v2304_v63, %v2303_v52  ;;  %v2361_v5 = vadd.f32 %v2360_v0, %v2359_v55 }
 0x237   :  { %v1049_v8 = vadd.f32 %v1048_v1, %v1047_v49 }
 0x238   :  { %v779_v10 = vadd.f32 %v2361_v5, %v2305_v4  ;;  %v2306_v11 = vpop.f32.mrb[24].mxu0  ;;  %v2362_v12 = vpop.f32.mrb[24].mxu1 }
 0x239   :  { %v2307_v13 = vpop.f32.mrb[25].mxu0  ;;  %v2363_v9 = vpop.f32.mrb[25].mxu1 }
 0x23a   :  { %v1050_v14 = vsel %vm1044_vm2, %v779_v10, 0.0  ;;  %v2308_v17 = vadd.f32 %v2307_v13, %v2306_v11  ;;  %v2364_v18 = vadd.f32 %v2363_v9, %v2362_v12 }
 0x23b   :  { %v1051_v21 = vadd.f32 %v1050_v14, %v1049_v8 }
 0x23c   :  { %v784_v22 = vadd.f32 %v2364_v18, %v2308_v17  ;;  %v2309_v23 = vpop.f32.mrb[26].mxu0  ;;  %v2365_v24 = vpop.f32.mrb[26].mxu1 }
 0x23d   :  { %v2310_v25 = vpop.f32.mrb[27].mxu0  ;;  %v2366_v46 = vpop.f32.mrb[27].mxu1 }
 0x23e   :  { %v2311_v47 = vadd.f32 %v2310_v25, %v2309_v23  ;;  %v2367_v48 = vadd.f32 %v2366_v46, %v2365_v24  ;;  %v1058_v0 = vsel %vm1044_vm2, %v784_v22, 0.0 }
 0x240   :  { %v789_v50 = vadd.f32 %v2367_v48, %v2311_v47  ;;  %v2312_v52 = vpop.f32.mrb[28].mxu0  ;;  %v2368_v49 = vpop.f32.mrb[28].mxu1 }
 0x241   :  { %v2313_v55 = vpop.f32.mrb[29].mxu0  ;;  %v2369_v63 = vpop.f32.mrb[29].mxu1 }
 0x242   :  { %v1059_v1 = vsel %vm1044_vm2, %v789_v50, 0.0  ;;  %v2314_v4 = vadd.f32 %v2313_v55, %v2312_v52  ;;  %v2370_v5 = vadd.f32 %v2369_v63, %v2368_v49 }
 0x243   :  { %v1060_v10 = vadd.f32 %v1059_v1, %v1058_v0  ;;  %v1052_v1 = vrot.slane %v1051_v21, 4 }
 0x244   :  { %v794_v8 = vadd.f32 %v2370_v5, %v2314_v4  ;;  %v2315_v11 = vpop.f32.mrb[30].mxu0  ;;  %v2371_v12 = vpop.f32.mrb[30].mxu1 }
 0x245   :  { %v2316_v13 = vpop.f32.mrb[31].mxu0  ;;  %v2372_v9 = vpop.f32.mrb[31].mxu1 }
 0x246   :  { %v1061_v14 = vsel %vm1044_vm2, %v794_v8, 0.0  ;;  %v2317_v17 = vadd.f32 %v2316_v13, %v2315_v11  ;;  %v2373_v18 = vadd.f32 %v2372_v9, %v2371_v12  ;;  %v1053_v9 = vadd.f32 %v1052_v1, %v1051_v21 }
 0x247   :  { %v1062_v23 = vadd.f32 %v1061_v14, %v1060_v10 }
 0x248   :  { %v799_v24 = vadd.f32 %v2373_v18, %v2317_v17  ;;  %v2406_v25 = vpop.f32.mrb[32].mxu0  ;;  %v2462_v46 = vpop.f32.mrb[32].mxu1 }
 0x249   :  { %v2407_v47 = vpop.f32.mrb[33].mxu0  ;;  %v2463_v22 = vpop.f32.mrb[33].mxu1 }
 0x24a   :  { %v1063_v48 = vsel %vm1044_vm2, %v799_v24, 0.0  ;;  %v2408_v50 = vadd.f32 %v2407_v47, %v2406_v25  ;;  %v2464_v52 = vadd.f32 %v2463_v22, %v2462_v46 }
 0x24b   :  { %v1064_v49 = vadd.f32 %v1063_v48, %v1062_v23 }
 0x24c   :  { %v1006_v55 = vadd.f32 %v2464_v52, %v2408_v50  ;;  %v2409_v63 = vpop.f32.mrb[34].mxu0  ;;  %v2465_v0 = vpop.f32.mrb[34].mxu1  ;;  %v1054_v50 = vrot.slane %v1053_v9, 2 }
 0x24d   :  { %v2410_v4 = vpop.f32.mrb[35].mxu0  ;;  %v2466_v5 = vpop.f32.mrb[35].mxu1  ;;  %v1065_v45 = vrot.slane %v1064_v49, 4 }
 0x24e   :  { %v2411_v8 = vadd.f32 %v2410_v4, %v2409_v63  ;;  %v2467_v11 = vadd.f32 %v2466_v5, %v2465_v0  ;;  %v1071_v18 = vsel %vm1044_vm2, %v1006_v55, 0.0  ;;  %v1055_v55 = vadd.f32 %v1054_v50, %v1053_v9 }
 0x250   :  { %v1011_v12 = vadd.f32 %v2467_v11, %v2411_v8  ;;  %v2412_v10 = vpop.f32.mrb[36].mxu0  ;;  %v2468_v13 = vpop.f32.mrb[36].mxu1 }
 0x251   :  { %v2413_v14 = vpop.f32.mrb[37].mxu0  ;;  %v2469_v17 = vpop.f32.mrb[37].mxu1 }
 0x252   :  { %v1072_v24 = vsel %vm1044_vm2, %v1011_v12, 0.0  ;;  %v2414_v25 = vadd.f32 %v2413_v14, %v2412_v10  ;;  %v2470_v23 = vadd.f32 %v2469_v17, %v2468_v13 }
 0x253   :  { %v1073_v46 = vadd.f32 %v1072_v24, %v1071_v18 }
 0x254   :  { %v1016_v47 = vadd.f32 %v2470_v23, %v2414_v25  ;;  %v2415_v22 = vpop.f32.mrb[38].mxu0  ;;  %v2471_v48 = vpop.f32.mrb[38].mxu1  ;;  %v1056_v23 = vrot.slane %v1055_v55, 1 }
 0x255   :  { %v2416_v52 = vpop.f32.mrb[39].mxu0  ;;  %v2472_v63 = vpop.f32.mrb[39].mxu1 }
 0x256   :  { %v1074_v0 = vsel %vm1044_vm2, %v1016_v47, 0.0  ;;  %v2417_v4 = vadd.f32 %v2416_v52, %v2415_v22  ;;  %v2473_v5 = vadd.f32 %v2472_v63, %v2471_v48 }
 0x257   :  { %v1075_v21 = vadd.f32 %v1074_v0, %v1073_v46 }
 0x258   :  { %v1021_v1 = vadd.f32 %v2473_v5, %v2417_v4  ;;  %v2418_v8 = vpop.f32.mrb[40].mxu0  ;;  %v2474_v11 = vpop.f32.mrb[40].mxu1  ;;  %v1057_v4 = vadd.f32 %v1056_v23, %v1055_v55  ;;  %v1066_v5 = vadd.f32 %v1065_v45, %v1064_v49 }
 0x259   :  { %v2419_v62 = vpop.f32.mrb[41].mxu0  ;;  %v2475_v12 = vpop.f32.mrb[41].mxu1 }
 0x25a   :  { %v1076_v10 = vsel %vm1044_vm2, %v1021_v1, 0.0  ;;  %v2420_v13 = vadd.f32 %v2419_v62, %v2418_v8  ;;  %v2476_v14 = vadd.f32 %v2475_v12, %v2474_v11 }
 0x25b   :  { %v1077_v17 = vadd.f32 %v1076_v10, %v1075_v21 }
 0x25c   :  { %v1026_v18 = vadd.f32 %v2476_v14, %v2420_v13  ;;  %v2421_v24 = vpop.f32.mrb[42].mxu0  ;;  %v2477_v25 = vpop.f32.mrb[42].mxu1 }
 0x25d   :  { %v1078_v47 = vrot.slane %v1077_v17, 4  ;;  %v2422_v22 = vpop.f32.mrb[43].mxu0  ;;  %v2478_v48 = vpop.f32.mrb[43].mxu1 }
 0x25e   :  { %v2423_v46 = vadd.f32 %v2422_v22, %v2421_v24  ;;  %v2479_v52 = vadd.f32 %v2478_v48, %v2477_v25  ;;  %v1084_v21 = vsel %vm1044_vm2, %v1026_v18, 0.0 }
 0x25f   :  { %v1079_v63 = vadd.f32 %v1078_v47, %v1077_v17  ;;  %v1097_v17 = vmul.f32 0.00012207031, %v1057_v4  ;;  %v1067_v47 = vrot.slane %v1066_v5, 2 }
 0x260   :  { %v1031_v0 = vadd.f32 %v2479_v52, %v2423_v46  ;;  %v2424_v9 = vpop.f32.mrb[44].mxu0  ;;  %v2480_v50 = vpop.f32.mrb[44].mxu1 }
 0x261   :  { %v1080_v1 = vrot.slane %v1079_v63, 2  ;;  %v2425_v62 = vpop.f32.mrb[45].mxu0  ;;  %v2481_v8 = vpop.f32.mrb[45].mxu1 }
 0x262   :  { %v1085_v11 = vsel %vm1044_vm2, %v1031_v0, 0.0  ;;  %v2426_v12 = vadd.f32 %v2425_v62, %v2424_v9  ;;  %v2482_v10 = vadd.f32 %v2481_v8, %v2480_v50  ;;  %v1100_v0 = vmul.f32 %v1097_v17, %v1097_v17 }
 0x263   :  { %v1081_v13 = vadd.f32 %v1080_v1, %v1079_v63  ;;  %v1086_v14 = vadd.f32 %v1085_v11, %v1084_v21  ;;  %v1068_v9 = vadd.f32 %v1067_v47, %v1066_v5 }
 0x264   :  { %v1036_v39 = vadd.f32 %v2482_v10, %v2426_v12  ;;  %v2427_v24 = vpop.f32.mrb[46].mxu0  ;;  %v2483_v25 = vpop.f32.mrb[46].mxu1 }
 0x265   :  { %v1082_v22 = vrot.slane %v1081_v13, 1  ;;  %v2428_v48 = vpop.f32.mrb[47].mxu0  ;;  %v2484_v55 = vpop.f32.mrb[47].mxu1  ;;  %v1069_v8 = vrot.slane %v1068_v9, 1 }
 0x266   :  { %v1087_v45 = vsel %vm1044_vm2, %v1036_v39, 0.0  ;;  %v2429_v49 = vadd.f32 %v2428_v48, %v2427_v24  ;;  %v2485_v23 = vadd.f32 %v2484_v55, %v2483_v25 }
 0x267   :  { %v1083_v46 = vadd.f32 %v1082_v22, %v1081_v13  ;;  %v1088_v18 = vadd.f32 %v1087_v45, %v1086_v14  ;;  %v1070_v10 = vadd.f32 %v1069_v8, %v1068_v9 }
 0x268   :  { %v1041_v52 = vadd.f32 %v2485_v23, %v2429_v49  ;;  %v4135_v49 = vmov 0.0  }
 0x269   :  { %v1099_v50 = vmul.f32 0.00012207031, %v1083_v46  ;;  %v1098_v25 = vmul.f32 0.00012207031, %v1070_v10 }
 0x26a   :  { %v1089_v63 = vsel %vm1044_vm2, %v1041_v52, 0.0 }
 0x26b   :  { %v1101_v1 = vsub.f32 %v1099_v50, %v1100_v0  ;;  %v1090_v62 = vadd.f32 %v1089_v63, %v1088_v18  ;;  %v1104_v22 = vmul.f32 %v1098_v25, %v1098_v25 }
 0x26d   :  { %v1102_v4 = vmax.f32 %v1101_v1, 0.0  ;;  %v1091_v21 = vrot.slane %v1090_v62, 4 }
 0x26f   :  { %v1107_v11 = vadd.f32 1e-05, %v1102_v4  ;;  %v1092_v12 = vadd.f32 %v1091_v21, %v1090_v62 }
 0x271   :  { %2692 = vrsqrt.f32 %v1107_v11  ;;  %v1093_v39 = vrot.slane %v1092_v12, 2 }
 0x273   :  { %v1094_v24 = vadd.f32 %v1093_v39, %v1092_v12 }
 0x275   :  { %v1095_v13 = vrot.slane %v1094_v24, 1 }
 0x277   :  { %v1096_v14 = vadd.f32 %v1095_v13, %v1094_v24  ;;  %v3803_v24 = vld [vmem:[%s4103_s1] sm:$0xff]  ;;  %v1989_v13 = vld [vmem:[#allocation8 + $0x30] sm:$0xff] }
 0x278   :  { %4136 = vst [vmem:[#allocation26_spill] sm:$0xff] %v3803_v24 }
 0x279   :  { %v1103_v48 = vmul.f32 0.00012207031, %v1096_v14 }
 0x27b   :  { %v2693_v5 = vpop.eup %2692  ;;  %v1105_v47 = vsub.f32 %v1103_v48, %v1104_v22  ;;  %v1787_v48 = vld [vmem:[%s4105_s3] sm:$0xff] }
 0x27c   :  { %2228 = vmatmul.mubr.msk.f32.vlgmr.msra.gmra.mrb[48].mxu0 %vm1044_vm2, %v2693_v5  ;;  %2231 = vmatmul.mubr.msk.f32.vlgmr.msra.gmra.mrb[48].mxu1 %vm1044_vm2, %v2693_v5  ;;  %v1284_v55 = vmul.f32 %v2693_v5, %v1097_v17  ;;  %v1791_v5 = vld [vmem:[%s4105_s3 + $0x20] sm:$0xff] }
 0x27d   :  { %v1106_v45 = vmax.f32 %v1105_v47, 0.0  ;;  %2233 = vmatpush1.msk.msra.mxu0 %vm1133_vm1, %v3709_v56  ;;  %1353 = vmatprep.mubr.f32.mxu0 %v4135_v49  ;;  %v1789_v47 = vld [vmem:[%s4105_s3 + $0x10] sm:$0xff] }
 0x27e   :  { %2236 = vmatpush1.msk.msra.mxu1 %vm1133_vm1, %v3711_v59  ;;  %1424 = vmatprep.mubr.f32.mxu1 %v4135_v49  ;;  %v1285_v23 = vsub.f32 0.0, %v1284_v55 }
 0x27f   :  { %v1109_v46 = vadd.f32 1e-05, %v1106_v45  ;;  %2238 = vmatprep.subr.msk.mxu0 %vm1133_vm1, %v3715_v60  ;;  %2241 = vmatprep.subr.msk.mxu1 %vm1133_vm1, %v3719_v61 }
 0x280   :  { %2234 = vmatmul.mubr.msk.f32.vlgmr.msra.gmra.mrb[50].mxu0 %vm1044_vm2, %v1285_v23  ;;  %2237 = vmatmul.mubr.msk.f32.vlgmr.msra.gmra.mrb[50].mxu1 %vm1044_vm2, %v1285_v23 }
 0x281   :  { %2694 = vrsqrt.f32 %v1109_v46  ;;  %2239 = vmatpush1.msk.msra.mxu0 %vm1133_vm1, %v3709_v56  ;;  %2242 = vmatpush1.msk.msra.mxu1 %vm1133_vm1, %v3711_v59  ;;  %v1793_v46 = vld [vmem:[%s4105_s3 + $0x30] sm:$0xff] }
 0x282   :  { %1498 = vmatprep.mubr.f32.mxu0 %v4135_v49  ;;  %1569 = vmatprep.mubr.f32.mxu1 %v4135_v49 }
 0x283   :  { %2244 = vmatprep.subr.msk.mxu0 %vm1133_vm1, %v3715_v60  ;;  %2247 = vmatprep.subr.msk.mxu1 %vm1133_vm1, %v3719_v61  ;;  %v3786_v61 = vsub.s32 0, %v3706_v51 }
 0x28b   :  { %v2695_v17 = vpop.eup %2694 }
 0x28c   :  { %2240 = vmatmul.mubr.msk.f32.vlgmr.msra.gmra.mrb[52].mxu0 %vm1044_vm2, %v2695_v17  ;;  %2243 = vmatmul.mubr.msk.f32.vlgmr.msra.gmra.mrb[52].mxu1 %vm1044_vm2, %v2695_v17  ;;  %v1576_v18 = vmul.f32 %v2695_v17, %v1098_v25  ;;  %v1797_v17 = vld [vmem:[%s4105_s3 + $0x50] sm:$0xff] }
 0x28d   :  { %2245 = vmatpush1.msk.msra.mxu0 %vm1133_vm1, %v3709_v56  ;;  %2248 = vmatpush1.msk.msra.mxu1 %vm1133_vm1, %v3711_v59 }
 0x28e   :  { %1645 = vmatprep.mubr.f32.mxu0 %v4135_v49  ;;  %1716 = vmatprep.mubr.f32.mxu1 %v4135_v49  ;;  %v1577_v60 = vsub.f32 0.0, %v1576_v18  ;;  %v1801_v18 = vld [vmem:[%s4105_s3 + $0x70] sm:$0xff] }
 0x290   :  { %2246 = vmatmul.mubr.msk.f32.vlgmr.msra.gmra.mrb[54].mxu0 %vm1044_vm2, %v1577_v60  ;;  %2249 = vmatmul.mubr.msk.f32.vlgmr.msra.gmra.mrb[54].mxu1 %vm1044_vm2, %v1577_v60 }
 0x34f   :  { %v1208_v52 = vpop.f32.mrb[48].mxu0  ;;  %v1279_v0 = vpop.f32.mrb[48].mxu1 }
 0x350   :  { %v1726_v9 = vrot.slane %v1208_v52, %v3786_v61  ;;  %v1734_v56 = vrot.slane %v1279_v0, %v3786_v61  ;;  %v1210_v50 = vpop.f32.mrb[49].mxu0  ;;  %v1281_v59 = vpop.f32.mrb[49].mxu1 }
 0x351   :  { %v1730_v63 = vrot.slane %v1210_v50, %v3786_v61  ;;  %v1738_v1 = vrot.slane %v1281_v59, %v3786_v61  ;;  %v1819_v59 = vld [vmem:[#allocation2] sm:$0xff] }
 0x352   :  { %v1739_v62 = vmul.f32 %v1726_v9, %v3516_v26  ;;  %v1743_v8 = vmul.f32 %v1726_v9, %v3524_v34  ;;  %v1747_v4 = vmul.f32 %v1726_v9, %v3546_v43  ;;  %v1751_v51 = vmul.f32 %v1726_v9, %v3556_v57  ;;  %v1983_v26 = vld [vmem:[#allocation8] sm:$0xff]  ;;  %v3820_v57 = vld [vmem:[%s4103_s1 + $0x10] sm:$0xff] }
 0x353   :  { %v1741_v21 = vmul.f32 %v1734_v56, %v3518_v27  ;;  %v1745_v11 = vmul.f32 %v1734_v56, %v3526_v35  ;;  %v1749_v12 = vmul.f32 %v1734_v56, %v3548_v53  ;;  %v1753_v10 = vmul.f32 %v1734_v56, %v3558_v58  ;;  %v1355_v39 = vpop.f32.mrb[50].mxu0  ;;  %v1987_v34 = vld [vmem:[#allocation8 + $0x20] sm:$0xff]  ;;  %v1426_v25 = vpop.f32.mrb[50].mxu1  ;;  %4137 = vst [vmem:[#allocation27_spill] sm:$0xff] %v3820_v57  ;;  %v1985_v58 = vld [vmem:[#allocation8 + $0x10] sm:$0xff] }
 0x354   :  { %v3806_v43 = vmul.f32 %v1730_v63, %v3520_v30  ;;  %v3809_v27 = vmul.f32 %v1730_v63, %v3530_v36  ;;  %v3812_v35 = vmul.f32 %v1730_v63, %v3550_v54  ;;  %v3815_v53 = vmul.f32 %v1730_v63, %v3562_v2  ;;  %v1357_v14 = vpop.f32.mrb[51].mxu0  ;;  %v1428_v22 = vpop.f32.mrb[51].mxu1  ;;  %v3879_v63 = vld [vmem:[%s4103_s1 + $0x8] sm:$0xff] }
 0x355   :  { %v3823_v30 = vmul.f32 %v1738_v1, %v3522_v31  ;;  %v3826_v36 = vmul.f32 %v1738_v1, %v3532_v42  ;;  %v3829_v54 = vmul.f32 %v1738_v1, %v3552_v37  ;;  %v3832_v2 = vmul.f32 %v1738_v1, %v3564_v3  ;;  %v1795_v42 = vld [vmem:[%s4105_s3 + $0x40] sm:$0xff]  ;;  %4138 = vst [vmem:[#allocation28_spill] sm:$0xff] %v3879_v63  ;;  %v1984_v1 = vld [vmem:[#allocation8 + $0x8] sm:$0xff] }
 0x356   :  { %v1758_v31 = vrot.slane %v1355_v39, %v3786_v61  ;;  %v1799_v37 = vld [vmem:[%s4105_s3 + $0x60] sm:$0xff]  ;;  %v1766_v3 = vrot.slane %v1426_v25, %v3786_v61  ;;  %v1762_v55 = vrot.slane %v1357_v14, %v3786_v61  ;;  %v3853_v45 = vrot.slane %v1428_v22, %v3786_v61  ;;  %v1988_v39 = vld [vmem:[#allocation8 + $0x28] sm:$0xff] }
 0x357   :  { %v3856_v49 = vmul.f32 %v1983_v26, %v3803_v24  ;;  %v3859_v23 = vmul.f32 %v1987_v34, %v3803_v24  ;;  %v3871_v60 = vmul.f32 %v1985_v58, %v3820_v57  ;;  %v3874_v52 = vmul.f32 %v1989_v13, %v3820_v57  ;;  %v3884_v13 = vld [vmem:[%s4103_s1 + $0x18] sm:$0xff]  ;;  %v1827_v57 = vld [vmem:[#allocation2 + $0x40] sm:$0xff] }
 0x358   :  { %v1771_v0 = vadd.f32 %v1758_v31, %v1739_v62  ;;  %v1775_v9 = vadd.f32 %v1758_v31, %v1743_v8  ;;  %v1779_v56 = vadd.f32 %v1758_v31, %v1747_v4  ;;  %v1783_v50 = vadd.f32 %v1758_v31, %v1751_v51  ;;  %4139 = vst [vmem:[#allocation29_spill] sm:$0xff] %v3884_v13  ;;  %v1986_v62 = vld [vmem:[#allocation8 + $0x18] sm:$0xff]  ;;  %v1823_v31 = vld [vmem:[#allocation2 + $0x20] sm:$0xff] }
 0x359   :  { %v1773_v26 = vadd.f32 %v1766_v3, %v1741_v21  ;;  %v1777_v34 = vadd.f32 %v1766_v3, %v1745_v11  ;;  %v1781_v25 = vadd.f32 %v1766_v3, %v1749_v12  ;;  %v1785_v58 = vadd.f32 %v1766_v3, %v1753_v10  ;;  %v1990_v8 = vld [vmem:[#allocation8 + $0x38] sm:$0xff]  ;;  %v1831_v24 = vld [vmem:[#allocation2 + $0x60] sm:$0xff]  ;;  %v1821_v12 = vld [vmem:[#allocation2 + $0x10] sm:$0xff] }
 0x35a   :  { %v1803_v4 = vmul.f32 %v1787_v48, %v1771_v0  ;;  %v1807_v51 = vmul.f32 %v1791_v5, %v1775_v9  ;;  %v1811_v14 = vmul.f32 %v1795_v42, %v1779_v56  ;;  %v1815_v22 = vmul.f32 %v1799_v37, %v1783_v50  ;;  %v1825_v10 = vld [vmem:[#allocation2 + $0x30] sm:$0xff] }
 0x35b   :  { %v1805_v29 = vmul.f32 %v1789_v47, %v1773_v26  ;;  %v1809_v16 = vmul.f32 %v1793_v46, %v1777_v34  ;;  %v1813_v21 = vmul.f32 %v1797_v17, %v1781_v25  ;;  %v1817_v11 = vmul.f32 %v1801_v18, %v1785_v58  ;;  %v1829_v3 = vld [vmem:[#allocation2 + $0x50] sm:$0xff]  ;;  %v1788_v17 = vld [vmem:[%s4105_s3 + $0x8] sm:$0xff] }
 0x35c   :  { %v1992_v38 = vmul.f32 %v1984_v1, %v3879_v63  ;;  %v3888_v28 = vmul.f32 %v1988_v39, %v3879_v63  ;;  %v3891_v48 = vmul.f32 %v1986_v62, %v3884_v13  ;;  %v3894_v5 = vmul.f32 %v1990_v8, %v3884_v13  ;;  %v1792_v18 = vld [vmem:[%s4105_s3 + $0x28] sm:$0xff]  ;;  %v1953_v63 = vld [vmem:[#allocation7 + $0x30] sm:$0xff] }
 0x35d   :  { %v1835_v42 = vadd.f32 %v1819_v59, %v1803_v4  ;;  %v3896_v37 = vadd.f32 %v1823_v31, %v1807_v51  ;;  %v1843_v47 = vadd.f32 %v1827_v57, %v1811_v14  ;;  %v3898_v46 = vadd.f32 %v1831_v24, %v1815_v22  ;;  %v1796_v24 = vld [vmem:[%s4105_s3 + $0x48] sm:$0xff] }
 0x35e   :  { %4140 = vst [vmem:[#allocation30_spill] sm:$0xff] %v3891_v48  ;;  %4141 = vst [vmem:[#allocation31_spill] sm:$0xff] %v3894_v5  ;;  %v1837_v0 = vadd.f32 %v1821_v12, %v1805_v29  ;;  %v3906_v9 = vadd.f32 %v1825_v10, %v1809_v16  ;;  %v1772_v56 = vadd.f32 %v1762_v55, %v3806_v43  ;;  %v1800_v57 = vld [vmem:[%s4105_s3 + $0x68] sm:$0xff]  ;;  %v1790_v43 = vld [vmem:[%s4105_s3 + $0x18] sm:$0xff] }
 0x35f   :  { %v1776_v50 = vadd.f32 %v1762_v55, %v3809_v27  ;;  %v1845_v59 = vadd.f32 %v1829_v3, %v1813_v21  ;;  %v3916_v1 = vadd.f32 %v1833_v44, %v1817_v11  ;;  %v1780_v39 = vadd.f32 %v1762_v55, %v3812_v35  ;;  %v1820_v29 = vld [vmem:[#allocation2 + $0x8] sm:$0xff]  ;;  %v1794_v27 = vld [vmem:[%s4105_s3 + $0x38] sm:$0xff]  ;;  %v1500_v26 = vpop.f32.mrb[52].mxu0  ;;  %v1571_v34 = vpop.f32.mrb[52].mxu1 }
 0x360   :  { %v1784_v16 = vadd.f32 %v1762_v55, %v3815_v53  ;;  %v1804_v25 = vmul.f32 %v1788_v17, %v1772_v56  ;;  %v1828_v62 = vld [vmem:[#allocation2 + $0x48] sm:$0xff]  ;;  %v1774_v44 = vadd.f32 %v3853_v45, %v3823_v30  ;;  %v1778_v35 = vadd.f32 %v3853_v45, %v3826_v36  ;;  %v1502_v53 = vpop.f32.mrb[53].mxu0  ;;  %v1573_v55 = vpop.f32.mrb[53].mxu1  ;;  %v1798_v21 = vld [vmem:[%s4105_s3 + $0x58] sm:$0xff] }
 0x361   :  { %v1808_v58 = vmul.f32 %v1792_v18, %v1776_v50  ;;  %v1812_v8 = vmul.f32 %v1796_v24, %v1780_v39  ;;  %v1824_v51 = vld [vmem:[#allocation2 + $0x28] sm:$0xff]  ;;  %v1782_v22 = vadd.f32 %v3853_v45, %v3829_v54  ;;  %v1786_v31 = vadd.f32 %v3853_v45, %v3832_v2  ;;  %v1802_v11 = vld [vmem:[%s4105_s3 + $0x78] sm:$0xff] }
 0x362   :  { %v1816_v4 = vmul.f32 %v1800_v57, %v1784_v16  ;;  %v1832_v14 = vld [vmem:[#allocation2 + $0x68] sm:$0xff]  ;;  %v3938_v30 = vadd.f32 %v3856_v49, %v1835_v42  ;;  %v1836_v36 = vadd.f32 %v1820_v29, %v1804_v25  ;;  %v1806_v12 = vmul.f32 %v1790_v43, %v1774_v44  ;;  %v1822_v3 = vld [vmem:[#allocation2 + $0x18] sm:$0xff] }
 0x363   :  { %v1810_v10 = vmul.f32 %v1794_v27, %v1778_v35  ;;  %v3944_v54 = vadd.f32 %v3859_v23, %v1843_v47  ;;  %v3947_v2 = vadd.f32 %v3871_v60, %v1837_v0  ;;  %v3950_v45 = vadd.f32 %v3874_v52, %v1845_v59  ;;  %v1826_v49 = vld [vmem:[#allocation2 + $0x38] sm:$0xff]  ;;  %v1647_v42 = vpop.f32.mrb[54].mxu0  ;;  %v1718_v18 = vpop.f32.mrb[54].mxu1 }
 0x364   :  { %v1844_v17 = vadd.f32 %v1828_v62, %v1812_v8  ;;  %v3952_v56 = vadd.f32 %v1824_v51, %v1808_v58  ;;  %v3954_v50 = vadd.f32 %v1832_v14, %v1816_v4  ;;  %v3956_v24 = vmul.f32 %v1798_v21, %v1782_v22  ;;  %v1649_v23 = vpop.f32.mrb[55].mxu0  ;;  %v1720_v47 = vpop.f32.mrb[55].mxu1  ;;  %v1919_v8 = vld [vmem:[#allocation5 + $0x20] sm:$0xff]  ;;  %v4148_v14 = vld [vmem:[#allocation19_spill] sm:$0xff] }
 0x365   :  { %v1854_v57 = vrot.slane %v1500_v26, %v3786_v61  ;;  %v3959_v39 = vadd.f32 %v1992_v38, %v1836_v36  ;;  %v3961_v60 = vmul.f32 %v1802_v11, %v1786_v31  ;;  %v3963_v52 = vadd.f32 %v1822_v3, %v1806_v12  ;;  %v1923_v4 = vld [vmem:[#allocation5 + $0x40] sm:$0xff]  ;;  %v4149_v31 = vld [vmem:[#allocation21_spill] sm:$0xff]  ;;  %v4150_v21 = vld [vmem:[#allocation23_spill] sm:$0xff] }
 0x366   :  { %4142 = vst [vmem:[#allocation32_spill] sm:$0xff] %v3954_v50  ;;  %v1862_v0 = vrot.slane %v1571_v34, %v3786_v61  ;;  %v3966_v59 = vadd.f32 %v1826_v49, %v1810_v10  ;;  %v3972_v27 = vadd.f32 %v3888_v28, %v1844_v17  ;;  %v1858_v62 = vrot.slane %v1502_v53, %v3786_v61  ;;  %v4147_v53 = vld [vmem:[#allocation24_spill] sm:$0xff]  ;;  %v1927_v51 = vld [vmem:[#allocation5 + $0x60] sm:$0xff]  ;;  %v4151_v36 = vld [vmem:[#allocation25_spill] sm:$0xff] }
 0x367   :  { %4143 = vst [vmem:[#allocation33_spill] sm:$0xff] %v3963_v52  ;;  %v1867_v16 = vmul.f32 %v1854_v57, %v3578_v6  ;;  %v1871_v29 = vmul.f32 %v1854_v57, %v3588_v19  ;;  %v1875_v43 = vmul.f32 %v1854_v57, %v3610_v32  ;;  %v1879_v38 = vmul.f32 %v1854_v57, %v3620_v40  ;;  %v1915_v32 = vld [vmem:[#allocation5] sm:$0xff]  ;;  %v1917_v3 = vld [vmem:[#allocation5 + $0x10] sm:$0xff] }
 0x368   :  { %4144 = vst [vmem:[#allocation34_spill] sm:$0xff] %v3966_v59  ;;  %v1869_v26 = vmul.f32 %v1862_v0, %v3580_v7  ;;  %v1873_v25 = vmul.f32 %v1862_v0, %v3590_v20  ;;  %v1877_v58 = vmul.f32 %v1862_v0, %v3612_v33  ;;  %v1881_v34 = vmul.f32 %v1862_v0, %v3622_v41  ;;  %v4145_v33 = vld [vmem:[#allocation20_spill] sm:$0xff]  ;;  %v4146_v41 = vld [vmem:[#allocation22_spill] sm:$0xff] }
 0x369   :  { %v1866_v6 = vrot.slane %v1573_v55, %v3786_v61  ;;  %v1886_v19 = vrot.slane %v1647_v42, %v3786_v61  ;;  %v1894_v28 = vrot.slane %v1718_v18, %v3786_v61  ;;  %v3984_v44 = vrot.slane %v1649_v23, %v3786_v61  ;;  %v1947_v12 = vld [vmem:[#allocation7] sm:$0xff]  ;;  %v1921_v57 = vld [vmem:[#allocation5 + $0x30] sm:$0xff] }
 0x36a   :  { %v3987_v7 = vrot.slane %v1720_v47, %v3786_v61  ;;  %v1868_v20 = vmul.f32 %v1858_v62, %v3582_v15  ;;  %v3991_v40 = vmul.f32 %v1858_v62, %v4145_v33  ;;  %v3994_v35 = vmul.f32 %v1858_v62, %v4146_v41  ;;  %v1951_v10 = vld [vmem:[#allocation7 + $0x20] sm:$0xff]  ;;  %v1925_v23 = vld [vmem:[#allocation5 + $0x50] sm:$0xff] }
 0x36b   :  { %v3997_v55 = vmul.f32 %v1858_v62, %v4147_v53  ;;  %v4000_v22 = vmul.f32 %v1866_v6, %v4148_v14  ;;  %v4003_v61 = vmul.f32 %v1866_v6, %v4149_v31  ;;  %v4006_v15 = vmul.f32 %v1866_v6, %v4150_v21  ;;  %v1929_v47 = vld [vmem:[#allocation5 + $0x70] sm:$0xff]  ;;  %v1955_v0 = vld [vmem:[#allocation7 + $0x40] sm:$0xff] }
 0x36c   :  { %v4009_v11 = vmul.f32 %v1866_v6, %v4151_v36  ;;  %v1899_v17 = vadd.f32 %v1886_v19, %v1867_v16  ;;  %v1903_v49 = vadd.f32 %v1886_v19, %v1871_v29  ;;  %v1907_v42 = vadd.f32 %v1886_v19, %v1875_v43  ;;  %v1959_v62 = vld [vmem:[#allocation7 + $0x60] sm:$0xff]  ;;  %v1949_v31 = vld [vmem:[#allocation7 + $0x10] sm:$0xff] }
 0x36d   :  { %v1911_v18 = vadd.f32 %v1886_v19, %v1879_v38  ;;  %v1901_v33 = vadd.f32 %v1894_v28, %v1869_v26  ;;  %v1905_v41 = vadd.f32 %v1894_v28, %v1873_v25  ;;  %v1909_v53 = vadd.f32 %v1894_v28, %v1877_v58  ;;  %v1957_v59 = vld [vmem:[#allocation7 + $0x50] sm:$0xff]  ;;  %v1830_v26 = vld [vmem:[#allocation2 + $0x58] sm:$0xff] }
 0x36e   :  { %v1913_v14 = vadd.f32 %v1894_v28, %v1881_v34  ;;  %v1931_v21 = vmul.f32 %v1915_v32, %v1899_v17  ;;  %v1935_v6 = vmul.f32 %v1919_v8, %v1903_v49  ;;  %v1939_v36 = vmul.f32 %v1923_v4, %v1907_v42  ;;  %v1961_v16 = vld [vmem:[#allocation7 + $0x70] sm:$0xff]  ;;  %v1834_v32 = vld [vmem:[#allocation2 + $0x78] sm:$0xff]  ;;  %v1952_v49 = vld [vmem:[#allocation7 + $0x28] sm:$0xff] }
 0x36f   :  { %v1943_v13 = vmul.f32 %v1927_v51, %v1911_v18  ;;  %v1933_v29 = vmul.f32 %v1917_v3, %v1901_v33  ;;  %v1937_v43 = vmul.f32 %v1921_v57, %v1905_v41  ;;  %v1941_v38 = vmul.f32 %v1925_v23, %v1909_v53  ;;  %v1956_v57 = vld [vmem:[#allocation7 + $0x48] sm:$0xff]  ;;  %v1922_v33 = vld [vmem:[#allocation5 + $0x38] sm:$0xff] }
 0x370   :  { %v1945_v19 = vmul.f32 %v1929_v47, %v1913_v14  ;;  %v1963_v5 = vadd.f32 %v1947_v12, %v1931_v21  ;;  %v1967_v48 = vadd.f32 %v1951_v10, %v1935_v6  ;;  %v1971_v52 = vadd.f32 %v1955_v0, %v1939_v36  ;;  %v1960_v23 = vld [vmem:[#allocation7 + $0x68] sm:$0xff]  ;;  %v1930_v53 = vld [vmem:[#allocation5 + $0x78] sm:$0xff] }
 0x371   :  { %v1975_v50 = vadd.f32 %v1959_v62, %v1943_v13  ;;  %v1965_v25 = vadd.f32 %v1949_v31, %v1933_v29  ;;  %v1969_v58 = vadd.f32 %v1953_v63, %v1937_v43  ;;  %v1973_v34 = vadd.f32 %v1957_v59, %v1941_v38  ;;  %v1928_v59 = vld [vmem:[#allocation5 + $0x68] sm:$0xff]  ;;  %v1918_v62 = vld [vmem:[#allocation5 + $0x18] sm:$0xff] }
 0x372   :  { %v1977_v28 = vadd.f32 %v1961_v16, %v1945_v19  ;;  %v2003_v8 = vadd.f32 %v3938_v30, %v1963_v5  ;;  %v2035_v4 = vadd.f32 %v3944_v54, %v1971_v52  ;;  %v4014_v51 = vadd.f32 %v1967_v48, %v3896_v37  ;;  %v1916_v37 = vld [vmem:[#allocation5 + $0x8] sm:$0xff]  ;;  %v1950_v36 = vld [vmem:[#allocation7 + $0x18] sm:$0xff] }
 0x373   :  { %v4017_v3 = vadd.f32 %v1975_v50, %v3898_v46  ;;  %v2005_v12 = vadd.f32 %v3947_v2, %v1965_v25  ;;  %v2037_v13 = vadd.f32 %v3950_v45, %v1973_v34  ;;  %v4022_v10 = vadd.f32 %v1969_v58, %v3906_v9  ;;  %v1920_v52 = vld [vmem:[#allocation5 + $0x28] sm:$0xff]  ;;  %v1958_v19 = vld [vmem:[#allocation7 + $0x58] sm:$0xff]  ;;  %v4152_v25 = vld [vmem:[#allocation32_spill] sm:$0xff] }
 0x374   :  { %v4025_v63 = vadd.f32 %v1977_v28, %v3916_v1  ;;  %v1846_v5 = vadd.f32 %v1830_v26, %v3956_v24  ;;  %v2250_v30 = vmul.f32 -1.442695, %v2003_v8  ;;  %v2039_v54 = vadd.f32 1.0, %v2035_v4  ;;  %v1924_v9 = vld [vmem:[#allocation5 + $0x48] sm:$0xff]  ;;  %v4153_v28 = vld [vmem:[#allocation33_spill] sm:$0xff] }
 0x375   :  { %v1900_v48 = vadd.f32 %v3984_v44, %v1868_v20  ;;  %v1850_v46 = vadd.f32 %v1834_v32, %v3961_v60  ;;  %v2252_v50 = vmul.f32 -1.442695, %v2005_v12  ;;  %v2041_v2 = vadd.f32 1.0, %v2037_v13  ;;  %v1948_v20 = vld [vmem:[#allocation7 + $0x8] sm:$0xff]  ;;  %v4154_v32 = vld [vmem:[#allocation30_spill] sm:$0xff] }
 0x376   :  { %v1904_v45 = vadd.f32 %v3984_v44, %v3991_v40  ;;  %2696 = vpow2.f32 %v2250_v30  ;;  %v2254_v1 = vmul.f32 -1.442695, %v2039_v54  ;;  %v1908_v24 = vadd.f32 %v3984_v44, %v3994_v35 }
 0x377   :  { %v1912_v17 = vadd.f32 %v3984_v44, %v3997_v55  ;;  %2698 = vpow2.f32 %v2252_v50  ;;  %v2256_v42 = vmul.f32 -1.442695, %v2041_v2  ;;  %v1932_v60 = vmul.f32 %v1916_v37, %v1900_v48  ;;  %v1926_v55 = vld [vmem:[#allocation5 + $0x58] sm:$0xff]  ;;  %v4156_v48 = vld [vmem:[#allocation34_spill] sm:$0xff] }
 0x378   :  { %v1936_v18 = vmul.f32 %v1920_v52, %v1904_v45  ;;  %2700 = vpow2.f32 %v2254_v1  ;;  %v1940_v40 = vmul.f32 %v1924_v9, %v1908_v24  ;;  %v1902_v0 = vadd.f32 %v3987_v7, %v4000_v22  ;;  %v1954_v22 = vld [vmem:[#allocation7 + $0x38] sm:$0xff] }
 0x379   :  { %v1944_v47 = vmul.f32 %v1928_v59, %v1912_v17  ;;  %2702 = vpow2.f32 %v2256_v42  ;;  %v1964_v35 = vadd.f32 %v1948_v20, %v1932_v60  ;;  %v1906_v44 = vadd.f32 %v3987_v7, %v4003_v61  ;;  %v1962_v61 = vld [vmem:[#allocation7 + $0x78] sm:$0xff] }
 0x37a   :  { %v1968_v41 = vadd.f32 %v1952_v49, %v1936_v18  ;;  %v1972_v14 = vadd.f32 %v1956_v57, %v1940_v40  ;;  %v1910_v21 = vadd.f32 %v3987_v7, %v4006_v15  ;;  %v1914_v6 = vadd.f32 %v3987_v7, %v4009_v11 }
 0x37b   :  { %v1976_v31 = vadd.f32 %v1960_v23, %v1944_v47  ;;  %v2004_v16 = vadd.f32 %v3959_v39, %v1964_v35  ;;  %v1934_v43 = vmul.f32 %v1918_v62, %v1902_v0  ;;  %v1938_v38 = vmul.f32 %v1922_v33, %v1906_v44  ;;  %v4155_v39 = vld [vmem:[#allocation31_spill] sm:$0xff]  ;;  %v4157_v35 = vld [vmem:[#allocation26_spill] sm:$0xff] }
 0x37c   :  { %v2068_v29 = vadd.f32 %v1968_v41, %v3952_v56  ;;  %v2036_v26 = vadd.f32 %v3972_v27, %v1972_v14  ;;  %v1942_v34 = vmul.f32 %v1926_v55, %v1910_v21  ;;  %v1946_v15 = vmul.f32 %v1930_v53, %v1914_v6  ;;  %v2091_v55 = vld [vmem:[%s4110_s8] sm:$0xff]  ;;  %v4158_v53 = vld [vmem:[#allocation27_spill] sm:$0xff]  ;;  %v2093_v6 = vld [vmem:[%s4110_s8 + $0x10] sm:$0xff] }
 0x37d   :  { %v4048_v58 = vadd.f32 %v1976_v31, %v4152_v25  ;;  %v2002_v7 = vadd.f32 %v4154_v32, %v4153_v28  ;;  %v2251_v11 = vmul.f32 -1.442695, %v2004_v16  ;;  %v1966_v8 = vadd.f32 %v1950_v36, %v1934_v43  ;;  %v4159_v32 = vld [vmem:[#allocation28_spill] sm:$0xff] }
 0x37e   :  { %v1970_v4 = vadd.f32 %v1954_v22, %v1938_v38  ;;  %v2034_v12 = vadd.f32 %v4155_v39, %v1846_v5  ;;  %v2040_v56 = vadd.f32 1.0, %v2036_v26  ;;  %v1974_v13 = vadd.f32 %v1958_v19, %v1942_v34 }
 0x37f   :  { %v1978_v30 = vadd.f32 %v1962_v61, %v1946_v15  ;;  %2704 = vpow2.f32 %v2251_v11  ;;  %v2006_v54 = vadd.f32 %v2002_v7, %v1966_v8  ;;  %v2092_v11 = vld [vmem:[%s4110_s8 + $0x8] sm:$0xff] }
 0x380   :  { %v2070_v27 = vadd.f32 %v1970_v4, %v4156_v48  ;;  %v2697_v37 = vpop.eup %2696  ;;  %2706 = vtanh.f32 %v4014_v51  ;;  %v2255_v52 = vmul.f32 -1.442695, %v2040_v56  ;;  %v2038_v50 = vadd.f32 %v2034_v12, %v1974_v13  ;;  %v4160_v13 = vld [vmem:[#allocation29_spill] sm:$0xff] }
 0x381   :  { %v4055_v2 = vadd.f32 %v1978_v30, %v1850_v46  ;;  %v2699_v45 = vpop.eup %2698  ;;  %v2019_v9 = vadd.f32 1.0, %v2697_v37  ;;  %2708 = vtanh.f32 %v4022_v10  ;;  %v2253_v20 = vmul.f32 -1.442695, %v2006_v54  ;;  %v2094_v54 = vld [vmem:[%s4110_s8 + $0x18] sm:$0xff] }
 0x382   :  { %v2701_v59 = vpop.eup %2700  ;;  %v2021_v5 = vadd.f32 1.0, %v2699_v45  ;;  %2710 = vpow2.f32 %v2255_v52  ;;  %v2042_v1 = vadd.f32 1.0, %v2038_v50 }
 0x383   :  { %v2703_v24 = vpop.eup %2702  ;;  %2712 = vrcp.f32 %v2019_v9  ;;  %v2055_v17 = vadd.f32 1.0, %v2701_v59 }
 0x384   :  { %2714 = vrcp.f32 %v2021_v5  ;;  %v2057_v49 = vadd.f32 1.0, %v2703_v24  ;;  %v2257_v42 = vmul.f32 -1.442695, %v2042_v1 }
 0x385   :  { %2716 = vrcp.f32 %v2055_v17 }
 0x386   :  { %2718 = vrcp.f32 %v2057_v49 }
 0x387   :  { %2720 = vpow2.f32 %v2253_v20 }
 0x388   :  { %2722 = vpow2.f32 %v2257_v42 }
 0x389   :  { %v2705_v51 = vpop.eup %2704  ;;  %2724 = vtanh.f32 %v2068_v29 }
 0x38a   :  { %v2707_v46 = vpop.eup %2706  ;;  %v2020_v60 = vadd.f32 1.0, %v2705_v51 }
 0x38b   :  { %v2709_v18 = vpop.eup %2708 }
 0x38c   :  { %v2711_v10 = vpop.eup %2710  ;;  %2726 = vrcp.f32 %v2020_v60 }
 0x38d   :  { %v2713_v57 = vpop.eup %2712  ;;  %v2056_v23 = vadd.f32 1.0, %v2711_v10 }
 0x38e   :  { %v2715_v40 = vpop.eup %2714  ;;  %v2083_v47 = vmul.f32 %v2713_v57, %v2707_v46 }
 0x38f   :  { %v2717_v0 = vpop.eup %2716  ;;  %v2085_v62 = vmul.f32 %v2715_v40, %v2709_v18  ;;  %2728 = vrcp.f32 %v2056_v23 }
 0x390   :  { %v2719_v33 = vpop.eup %2718  ;;  %v2079_v41 = vmul.f32 %v2717_v0, %v4157_v35  ;;  %2730 = vtanh.f32 %v2070_v27 }
 0x391   :  { %v2721_v44 = vpop.eup %2720  ;;  %v2081_v14 = vmul.f32 %v2719_v33, %v4158_v53 }
 0x392   :  { %v2723_v31 = vpop.eup %2722  ;;  %v2087_v21 = vadd.f32 %v2083_v47, %v2079_v41  ;;  %v2022_v36 = vadd.f32 1.0, %v2721_v44 }
 0x393   :  { %v2089_v22 = vadd.f32 %v2085_v62, %v2081_v14  ;;  %v2058_v16 = vadd.f32 1.0, %v2723_v31  ;;  %v2725_v43 = vpop.eup %2724 }
 0x394   :  { %v2095_v29 = vmul.f32 %v2091_v55, %v2087_v21  ;;  %2139 = vst [vmem:[#allocation12] sm:$0xff] %v2087_v21  ;;  %2732 = vrcp.f32 %v2022_v36 }
 0x395   :  { %v2097_v38 = vmul.f32 %v2093_v6, %v2089_v22  ;;  %2141 = vst [vmem:[#allocation12 + $0x10] sm:$0xff] %v2089_v22  ;;  %2734 = vrcp.f32 %v2058_v16 }
 0x396   :  { %v2727_v19 = vpop.eup %2726  ;;  %v2099_v61 = vadd.f32 %v2095_v29, %v4017_v3 }
 0x397   :  { %v2101_v26 = vadd.f32 %v2097_v38, %v4025_v63  ;;  %v2084_v25 = vmul.f32 %v2727_v19, %v2725_v43 }
 0x398   :  { %v2258_v34 = vmul.f32 -1.442695, %v2099_v61 }
 0x399   :  { %v2729_v15 = vpop.eup %2728  ;;  %v2260_v28 = vmul.f32 -1.442695, %v2101_v26 }
 0x39a   :  { %2736 = vpow2.f32 %v2258_v34  ;;  %v2080_v7 = vmul.f32 %v2729_v15, %v4159_v32  ;;  %v2731_v4 = vpop.eup %2730 }
 0x39b   :  { %2738 = vpow2.f32 %v2260_v28 }
 0x39c   :  { %v2088_v8 = vadd.f32 %v2084_v25, %v2080_v7 }
 0x39e   :  { %v2733_v39 = vpop.eup %2732  ;;  %v2096_v12 = vmul.f32 %v2092_v11, %v2088_v8  ;;  %2140 = vst [vmem:[#allocation12 + $0x8] sm:$0xff] %v2088_v8 }
 0x39f   :  { %v2735_v3 = vpop.eup %2734  ;;  %v2086_v56 = vmul.f32 %v2733_v39, %v2731_v4 }
 0x3a0   :  { %v2100_v63 = vadd.f32 %v2096_v12, %v4048_v58  ;;  %v2082_v30 = vmul.f32 %v2735_v3, %v4160_v13 }
 0x3a2   :  { %v2259_v48 = vmul.f32 -1.442695, %v2100_v63  ;;  %v2090_v27 = vadd.f32 %v2086_v56, %v2082_v30 }
 0x3a4   :  { %v2737_v37 = vpop.eup %2736  ;;  %2740 = vpow2.f32 %v2259_v48  ;;  %v2098_v52 = vmul.f32 %v2094_v54, %v2090_v27  ;;  %2142 = vst [vmem:[#allocation12 + $0x18] sm:$0xff] %v2090_v27 }
 0x3a5   :  { %v2739_v50 = vpop.eup %2738  ;;  %v2115_v45 = vadd.f32 1.0, %v2737_v37  ;;  %2742 = vtanh.f32 %v2087_v21 }
 0x3a6   :  { %2881 = shalt.err (!%p2878_p2)
}
 0x3a7   :  { %s2882_s8 = scalar_lea.hbm %s4114_s12, 512 }
 0x3a8   :  { %p2883_p3 = scmp.ne.s32.totalorder %s4114_s12, %s2882_s8  ;;  %p2886_p4 = scmp.lt.u32.totalorder %s2882_s8, %s4114_s12 }
 0x3aa   :  { %p2888_p5 = pnand %p2886_p4, %p2883_p3 }
 0x3ac   :  { %2891 = shalt.err (!%p2888_p5)
}
 0x3ad   :  { %2162 = dma.vmem_to_hbm [thread:$0]  %s2160_s27, 512, %s4114_s12, [#allocation13]   ;;  %v2117_v58 = vadd.f32 1.0, %v2739_v50  ;;  %v2102_v9 = vadd.f32 %v2098_v52, %v4055_v2  ;;  %2744 = vtanh.f32 %v2089_v22 }
 0x3ae   :  { %2746 = vrcp.f32 %v2115_v45  ;;  %v2741_v5 = vpop.eup %2740  ;;  %s2934_s12 = smov [#allocation11]  }
 0x3af   :  { %2748 = vrcp.f32 %v2117_v58  ;;  %v2261_v59 = vmul.f32 -1.442695, %v2102_v9  ;;  %v2743_v1 = vpop.eup %2742  ;;  %v2116_v24 = vadd.f32 1.0, %v2741_v5  ;;  %s2149_s13 = sshll.u32 %s2934_s12, 4  ;;  %s2150_s13 = int_to_ptr.vmem [resolvable:$true] %s2149_s13 }
 0x3b0   :  { %s2892_s10 = scalar_lea.vmem %s2150_s13, 512  ;;  %p2897_p7 = scmp.lt.s32.totalorder %s2150_s13, %s2150_s13 }
 0x3b1   :  { %2750 = vpow2.f32 %v2261_v59  ;;  %p2893_p6 = scmp.ne.s32.totalorder %s2150_s13, %s2892_s10  ;;  %p2898_p8 = scmp.lt.s32.totalorder %s2892_s10, %s2892_s10 }
 0x3b2   :  { %2752 = vtanh.f32 %v2088_v8 }
 0x3b3   :  { %2754 = vrcp.f32 %v2116_v24  ;;  %p2899_p9 = por %p2898_p8, %p2897_p7 }
 0x3b4   :  { %2756 = vtanh.f32 %v2090_v27 }
 0x3b5   :  { %p2900_p10 = pnand %p2899_p9, %p2893_p6 }
 0x3b7   :  { %v2745_v17 = vpop.eup %2744 }
 0x3b8   :  { %v2747_v20 = vpop.eup %2746 }
 0x3b9   :  { %v2749_v49 = vpop.eup %2748  ;;  %v2131_v42 = vmul.f32 %v2747_v20, %v2743_v1 }
 0x3ba   :  { %v2133_v51 = vmul.f32 %v2749_v49, %v2745_v17 }
 0x3bb   :  { %v2751_v46 = vpop.eup %2750  ;;  %2135 = vst [vmem:[#allocation11] sm:$0xff] %v2131_v42 }
 0x3bc   :  { %v2118_v60 = vadd.f32 1.0, %v2751_v46  ;;  %2137 = vst [vmem:[#allocation11 + $0x10] sm:$0xff] %v2133_v51  ;;  %v2753_v2 = vpop.eup %2752 }
 0x3bd   :  { %v2755_v18 = vpop.eup %2754 }
 0x3be   :  { %2758 = vrcp.f32 %v2118_v60  ;;  %v2132_v10 = vmul.f32 %v2755_v18, %v2753_v2  ;;  %v2757_v57 = vpop.eup %2756 }
 0x3c0   :  { %2136 = vst [vmem:[#allocation11 + $0x8] sm:$0xff] %v2132_v10 }
 0x3c8   :  { %v2759_v23 = vpop.eup %2758 }
 0x3c9   :  { %v2134_v40 = vmul.f32 %v2759_v23, %v2757_v57 }
 0x3cb   :  { %2138 = vst [vmem:[#allocation11 + $0x18] sm:$0xff] %v2134_v40 }
 0x3cc   :  { %2903 = shalt.err (!%p2900_p10)
}
 0x3cd   :  { %s2904_s18 = scalar_lea.hbm %s4113_s11, 512 }
 0x3ce   :  { %p2905_p11 = scmp.ne.s32.totalorder %s4113_s11, %s2904_s18  ;;  %p2908_p12 = scmp.lt.u32.totalorder %s2904_s18, %s4113_s11 }
 0x3d0   :  { %p2910_p13 = pnand %p2908_p12, %p2905_p11 }
 0x3d2   :  { %2913 = shalt.err (!%p2910_p13)
}
 0x3d3   :  { %2152 = dma.vmem_to_hbm [thread:$0]  %s2150_s13, 512, %s4113_s11, [#allocation4]  }
 0x3d4   :  { %2920 = dma.done.wait [#allocation4], 512  }
 0x3d5   :  { %2921 = vsyncadd [#allocation4], 4294966784 }
 0x3d6   :  { %2922 = dma.done.wait [#allocation13], 512  }
 0x3d7   :  { %2923 = vsyncadd [#allocation13], 4294966784 }
 0x3d8   :  { %2169 = vsyncpa [#allocation3], 1 }
 0x3d9   :  { %2170 = vsyncpa [#allocation6], 1 }
 0x3da   :  { %2171 = vsyncpa [#allocation9], 1 }
 0x3db   :  { %2172 = vsyncpa [#allocation4], 1 }
 0x3dc   :  { %2173 = vsyncpa [#allocation13], 1 }

</bundles_post_ra>
